<compile_context>
chip_gen: v7x
topology: tpu7x:2x2x1
jax: 0.10.0
libtpu: 0.0.40
codegen_flags: <defaults>
</compile_context>

<pallas_src>
import functools

import jax
import jax.numpy as jnp
from jax.experimental import pallas as pl
from jax.experimental.pallas import tpu as pltpu


def _round_up(x, m):
    return (x + m - 1) // m * m


def _bprmf_kernel(user_idx_ref, pos_idx_ref, neg_idx_ref,   # scalar prefetch (SMEM)
                  user_tab_ref, item_tab_ref,                # raw HBM refs (pl.ANY)
                  out_ref,                                   # (B_pad, N_pad) VMEM out
                  u_s, items_s, sem,                         # VMEM scratch + DMA sems
                  *, B, B_pad, N_pad, U, I):
    H = u_s.shape[1]

    # Zero only the padding rows (disjoint from the DMA destinations), so the
    # padded part of the fused output is well-defined garbage-free.
    if B_pad > B:
        u_s[pl.ds(B, B_pad - B), :] = jnp.zeros((B_pad - B, H), u_s.dtype)
    if N_pad > 2 * B:
        items_s[pl.ds(2 * B, N_pad - 2 * B), :] = jnp.zeros(
            (N_pad - 2 * B, H), items_s.dtype)

    # Gather DMA: one HBM table row -> one VMEM scratch row per index.
    # B is a small static constant, so this Python loop unrolls at trace time.
    # Issue ALL copies, then wait, so the 3*B row fetches overlap each other.
    copies = []
    for b in range(B):
        uid = jnp.clip(user_idx_ref[b], 0, U - 1)
        pid = jnp.clip(pos_idx_ref[b], 0, I - 1)
        nid = jnp.clip(neg_idx_ref[b], 0, I - 1)
        copies.append(pltpu.make_async_copy(
            user_tab_ref.at[pl.ds(uid, 1), :], u_s.at[pl.ds(b, 1), :], sem.at[0]))
        copies.append(pltpu.make_async_copy(
            item_tab_ref.at[pl.ds(pid, 1), :], items_s.at[pl.ds(b, 1), :], sem.at[1]))
        copies.append(pltpu.make_async_copy(
            item_tab_ref.at[pl.ds(nid, 1), :], items_s.at[pl.ds(B + b, 1), :], sem.at[2]))
    for c in copies:
        c.start()
    for c in copies:
        c.wait()

    # One fused MXU pass: (B_pad, H) x (N_pad, H) contracted on H -> (B_pad, N_pad).
    # Columns [0, B) are pred_i, columns [B, 2B) are pred_j.
    dn = (((1,), (1,)), ((), ()))
    out_ref[...] = jax.lax.dot_general(
        u_s[...], items_s[...], dn, preferred_element_type=jnp.float32)


def bprmf_forward(user_tab, item_tab, user_idx, pos_idx, neg_idx):
    """Pallas equivalent of BPRMF.forward.

    user_tab: (user_num+1, H) f32, item_tab: (item_num+1, H) f32
    user_idx / pos_idx / neg_idx: (B,) int32
    returns (pred_i, pred_j), each (B, B) f32.
    """
    B = user_idx.shape[0]
    U, H = user_tab.shape
    I, _ = item_tab.shape
    B_pad = _round_up(B, 8)          # sublane-aligned rows
    N_pad = _round_up(2 * B, 128)    # lane-dense fused output width

    kernel = functools.partial(
        _bprmf_kernel, B=B, B_pad=B_pad, N_pad=N_pad, U=U, I=I)

    grid_spec = pltpu.PrefetchScalarGridSpec(
        num_scalar_prefetch=3,
        grid=(1,),
        in_specs=[
            pl.BlockSpec(memory_space=pl.ANY),   # user table stays in HBM
            pl.BlockSpec(memory_space=pl.ANY),   # item table stays in HBM
        ],
        out_specs=pl.BlockSpec((B_pad, N_pad), lambda i, ui, pi, ni: (0, 0)),
        scratch_shapes=[
            pltpu.VMEM((B_pad, H), jnp.float32),   # gathered user rows
            pltpu.VMEM((N_pad, H), jnp.float32),   # gathered pos|neg item rows
            pltpu.SemaphoreType.DMA((3,)),         # one sem per gather stream
        ],
    )

    out = pl.pallas_call(
        kernel,
        grid_spec=grid_spec,
        out_shape=jax.ShapeDtypeStruct((B_pad, N_pad), jnp.float32),
        compiler_params=pltpu.CompilerParams(
            dimension_semantics=("arbitrary",)),
    )(user_idx, pos_idx, neg_idx, user_tab, item_tab)

    pred_i = out[:B, :B]
    pred_j = out[:B, B:2 * B]
    return pred_i, pred_j


if __name__ == "__main__":
    # Small, deterministic setup consistent with BPRMF.__init__:
    #   user_emb: (user_num+1, hidden), item_emb: (item_num+1, hidden)
    user_num, item_num, hidden, batch = 50, 100, 32, 8

    key = jax.random.PRNGKey(0)
    k1, k2, k3, k4, k5 = jax.random.split(key, 5)
    # torch.nn.Embedding default init is N(0, 1)
    user_tab = jax.random.normal(k1, (user_num + 1, hidden), jnp.float32)
    item_tab = jax.random.normal(k2, (item_num + 1, hidden), jnp.float32)
    user_idx = jax.random.randint(k3, (batch,), 0, user_num + 1, jnp.int32)
    pos_idx = jax.random.randint(k4, (batch,), 0, item_num + 1, jnp.int32)
    neg_idx = jax.random.randint(k5, (batch,), 0, item_num + 1, jnp.int32)

    pred_i, pred_j = bprmf_forward(user_tab, item_tab, user_idx, pos_idx, neg_idx)
    jax.block_until_ready((pred_i, pred_j))

    # Pure-JAX reference of the exact torch semantics.
    u = user_tab[user_idx]
    ii = item_tab[pos_idx]
    ij = item_tab[neg_idx]
    ref_i = u @ ii.T   # torch: item_i.matmul(user.unsqueeze(-1)).squeeze(-1) -> (B, B)
    ref_j = u @ ij.T

    assert pred_i.shape == (batch, batch) and pred_j.shape == (batch, batch)
    assert pred_i.dtype == jnp.float32 and pred_j.dtype == jnp.float32
    assert jnp.allclose(pred_i, ref_i, atol=1e-5, rtol=1e-5)
    assert jnp.allclose(pred_j, ref_j, atol=1e-5, rtol=1e-5)
    print("KERNEL_OK")
</pallas_src>

<mosaic_0001>
module attributes {stable_mosaic.version = 11 : i64} {
  func.func @_bprmf_kernel(%arg0: i32, %arg1: memref<8xi32, #tpu.memory_space<smem>>, %arg2: memref<8xi32, #tpu.memory_space<smem>>, %arg3: memref<8xi32, #tpu.memory_space<smem>>, %arg4: memref<51x32xf32, #tpu.memory_space<any>>, %arg5: memref<101x32xf32, #tpu.memory_space<any>>, %arg6: memref<8x128xf32, #tpu.memory_space<vmem>>, %arg7: memref<8x32xf32, #tpu.memory_space<vmem>>, %arg8: memref<128x32xf32, #tpu.memory_space<vmem>>, %arg9: memref<3x!tpu.dma_semaphore, #tpu.memory_space<semaphore_mem>>) attributes {dimension_semantics = [#tpu.dimension_semantics<arbitrary>], iteration_bounds = array<i64: 1>, scalar_prefetch = 3 : i64, scratch_operands = 3 : i64, tpu.core_type = #tpu.core_type<tc>, window_params = [{}, {}, {pipeline_mode = #tpu.pipeline_mode<synchronous>, transform_indices = @transform_2, window_bounds = array<i64: 8, 128>}]} {
    %cst = arith.constant 0.000000e+00 : f32
    %0 = vector.broadcast %cst : f32 to vector<112x32xf32>
    %c16 = arith.constant 16 : index
    %c0 = arith.constant 0 : index
    %1 = vector.load %arg8[%c16, %c0] : memref<128x32xf32, #tpu.memory_space<vmem>>, vector<112x32xf32>
    tpu.vector_store %arg8[%c16, %c0], %0 {strides = array<i32>} : memref<128x32xf32, #tpu.memory_space<vmem>>, vector<112x32xf32>,
    %c0_0 = arith.constant 0 : index
    %2 = memref.load %arg1[%c0_0] : memref<8xi32, #tpu.memory_space<smem>>
    %c0_i32 = arith.constant 0 : i32
    %c50_i32 = arith.constant 50 : i32
    %3 = arith.maxsi %c0_i32, %2 : i32
    %4 = arith.minsi %c50_i32, %3 : i32
    %c0_1 = arith.constant 0 : index
    %5 = memref.load %arg2[%c0_1] : memref<8xi32, #tpu.memory_space<smem>>
    %c0_i32_2 = arith.constant 0 : i32
    %c100_i32 = arith.constant 100 : i32
    %6 = arith.maxsi %c0_i32_2, %5 : i32
    %7 = arith.minsi %c100_i32, %6 : i32
    %c0_3 = arith.constant 0 : index
    %8 = memref.load %arg3[%c0_3] : memref<8xi32, #tpu.memory_space<smem>>
    %c0_i32_4 = arith.constant 0 : i32
    %c100_i32_5 = arith.constant 100 : i32
    %9 = arith.maxsi %c0_i32_4, %8 : i32
    %10 = arith.minsi %c100_i32_5, %9 : i32
    %c1 = arith.constant 1 : index
    %11 = memref.load %arg1[%c1] : memref<8xi32, #tpu.memory_space<smem>>
    %c0_i32_6 = arith.constant 0 : i32
    %c50_i32_7 = arith.constant 50 : i32
    %12 = arith.maxsi %c0_i32_6, %11 : i32
    %13 = arith.minsi %c50_i32_7, %12 : i32
    %c1_8 = arith.constant 1 : index
    %14 = memref.load %arg2[%c1_8] : memref<8xi32, #tpu.memory_space<smem>>
    %c0_i32_9 = arith.constant 0 : i32
    %c100_i32_10 = arith.constant 100 : i32
    %15 = arith.maxsi %c0_i32_9, %14 : i32
    %16 = arith.minsi %c100_i32_10, %15 : i32
    %c1_11 = arith.constant 1 : index
    %17 = memref.load %arg3[%c1_11] : memref<8xi32, #tpu.memory_space<smem>>
    %c0_i32_12 = arith.constant 0 : i32
    %c100_i32_13 = arith.constant 100 : i32
    %18 = arith.maxsi %c0_i32_12, %17 : i32
    %19 = arith.minsi %c100_i32_13, %18 : i32
    %c2 = arith.constant 2 : index
    %20 = memref.load %arg1[%c2] : memref<8xi32, #tpu.memory_space<smem>>
    %c0_i32_14 = arith.constant 0 : i32
    %c50_i32_15 = arith.constant 50 : i32
    %21 = arith.maxsi %c0_i32_14, %20 : i32
    %22 = arith.minsi %c50_i32_15, %21 : i32
    %c2_16 = arith.constant 2 : index
    %23 = memref.load %arg2[%c2_16] : memref<8xi32, #tpu.memory_space<smem>>
    %c0_i32_17 = arith.constant 0 : i32
    %c100_i32_18 = arith.constant 100 : i32
    %24 = arith.maxsi %c0_i32_17, %23 : i32
    %25 = arith.minsi %c100_i32_18, %24 : i32
    %c2_19 = arith.constant 2 : index
    %26 = memref.load %arg3[%c2_19] : memref<8xi32, #tpu.memory_space<smem>>
    %c0_i32_20 = arith.constant 0 : i32
    %c100_i32_21 = arith.constant 100 : i32
    %27 = arith.maxsi %c0_i32_20, %26 : i32
    %28 = arith.minsi %c100_i32_21, %27 : i32
    %c3 = arith.constant 3 : index
    %29 = memref.load %arg1[%c3] : memref<8xi32, #tpu.memory_space<smem>>
    %c0_i32_22 = arith.constant 0 : i32
    %c50_i32_23 = arith.constant 50 : i32
    %30 = arith.maxsi %c0_i32_22, %29 : i32
    %31 = arith.minsi %c50_i32_23, %30 : i32
    %c3_24 = arith.constant 3 : index
    %32 = memref.load %arg2[%c3_24] : memref<8xi32, #tpu.memory_space<smem>>
    %c0_i32_25 = arith.constant 0 : i32
    %c100_i32_26 = arith.constant 100 : i32
    %33 = arith.maxsi %c0_i32_25, %32 : i32
    %34 = arith.minsi %c100_i32_26, %33 : i32
    %c3_27 = arith.constant 3 : index
    %35 = memref.load %arg3[%c3_27] : memref<8xi32, #tpu.memory_space<smem>>
    %c0_i32_28 = arith.constant 0 : i32
    %c100_i32_29 = arith.constant 100 : i32
    %36 = arith.maxsi %c0_i32_28, %35 : i32
    %37 = arith.minsi %c100_i32_29, %36 : i32
    %c4 = arith.constant 4 : index
    %38 = memref.load %arg1[%c4] : memref<8xi32, #tpu.memory_space<smem>>
    %c0_i32_30 = arith.constant 0 : i32
    %c50_i32_31 = arith.constant 50 : i32
    %39 = arith.maxsi %c0_i32_30, %38 : i32
    %40 = arith.minsi %c50_i32_31, %39 : i32
    %c4_32 = arith.constant 4 : index
    %41 = memref.load %arg2[%c4_32] : memref<8xi32, #tpu.memory_space<smem>>
    %c0_i32_33 = arith.constant 0 : i32
    %c100_i32_34 = arith.constant 100 : i32
    %42 = arith.maxsi %c0_i32_33, %41 : i32
    %43 = arith.minsi %c100_i32_34, %42 : i32
    %c4_35 = arith.constant 4 : index
    %44 = memref.load %arg3[%c4_35] : memref<8xi32, #tpu.memory_space<smem>>
    %c0_i32_36 = arith.constant 0 : i32
    %c100_i32_37 = arith.constant 100 : i32
    %45 = arith.maxsi %c0_i32_36, %44 : i32
    %46 = arith.minsi %c100_i32_37, %45 : i32
    %c5 = arith.constant 5 : index
    %47 = memref.load %arg1[%c5] : memref<8xi32, #tpu.memory_space<smem>>
    %c0_i32_38 = arith.constant 0 : i32
    %c50_i32_39 = arith.constant 50 : i32
    %48 = arith.maxsi %c0_i32_38, %47 : i32
    %49 = arith.minsi %c50_i32_39, %48 : i32
    %c5_40 = arith.constant 5 : index
    %50 = memref.load %arg2[%c5_40] : memref<8xi32, #tpu.memory_space<smem>>
    %c0_i32_41 = arith.constant 0 : i32
    %c100_i32_42 = arith.constant 100 : i32
    %51 = arith.maxsi %c0_i32_41, %50 : i32
    %52 = arith.minsi %c100_i32_42, %51 : i32
    %c5_43 = arith.constant 5 : index
    %53 = memref.load %arg3[%c5_43] : memref<8xi32, #tpu.memory_space<smem>>
    %c0_i32_44 = arith.constant 0 : i32
    %c100_i32_45 = arith.constant 100 : i32
    %54 = arith.maxsi %c0_i32_44, %53 : i32
    %55 = arith.minsi %c100_i32_45, %54 : i32
    %c6 = arith.constant 6 : index
    %56 = memref.load %arg1[%c6] : memref<8xi32, #tpu.memory_space<smem>>
    %c0_i32_46 = arith.constant 0 : i32
    %c50_i32_47 = arith.constant 50 : i32
    %57 = arith.maxsi %c0_i32_46, %56 : i32
    %58 = arith.minsi %c50_i32_47, %57 : i32
    %c6_48 = arith.constant 6 : index
    %59 = memref.load %arg2[%c6_48] : memref<8xi32, #tpu.memory_space<smem>>
    %c0_i32_49 = arith.constant 0 : i32
    %c100_i32_50 = arith.constant 100 : i32
    %60 = arith.maxsi %c0_i32_49, %59 : i32
    %61 = arith.minsi %c100_i32_50, %60 : i32
    %c6_51 = arith.constant 6 : index
    %62 = memref.load %arg3[%c6_51] : memref<8xi32, #tpu.memory_space<smem>>
    %c0_i32_52 = arith.constant 0 : i32
    %c100_i32_53 = arith.constant 100 : i32
    %63 = arith.maxsi %c0_i32_52, %62 : i32
    %64 = arith.minsi %c100_i32_53, %63 : i32
    %c7 = arith.constant 7 : index
    %65 = memref.load %arg1[%c7] : memref<8xi32, #tpu.memory_space<smem>>
    %c0_i32_54 = arith.constant 0 : i32
    %c50_i32_55 = arith.constant 50 : i32
    %66 = arith.maxsi %c0_i32_54, %65 : i32
    %67 = arith.minsi %c50_i32_55, %66 : i32
    %c7_56 = arith.constant 7 : index
    %68 = memref.load %arg2[%c7_56] : memref<8xi32, #tpu.memory_space<smem>>
    %c0_i32_57 = arith.constant 0 : i32
    %c100_i32_58 = arith.constant 100 : i32
    %69 = arith.maxsi %c0_i32_57, %68 : i32
    %70 = arith.minsi %c100_i32_58, %69 : i32
    %c7_59 = arith.constant 7 : index
    %71 = memref.load %arg3[%c7_59] : memref<8xi32, #tpu.memory_space<smem>>
    %c0_i32_60 = arith.constant 0 : i32
    %c100_i32_61 = arith.constant 100 : i32
    %72 = arith.maxsi %c0_i32_60, %71 : i32
    %73 = arith.minsi %c100_i32_61, %72 : i32
    %c0_i32_62 = arith.constant 0 : i32
    %c0_i32_63 = arith.constant 0 : i32
    %74 = tpu.memref_slice %arg4[%4, %c0_i32_63] : memref<51x32xf32, #tpu.memory_space<any>> -> memref<1x32xf32, #tpu.memory_space<any>>
    %c0_i32_64 = arith.constant 0 : i32
    %c0_i32_65 = arith.constant 0 : i32
    %75 = tpu.memref_slice %arg7[%c0_i32_64, %c0_i32_65] : memref<8x32xf32, #tpu.memory_space<vmem>> -> memref<1x32xf32, #tpu.memory_space<vmem>>
    %76 = tpu.memref_slice %arg9[%c0_i32_62] : memref<3x!tpu.dma_semaphore, #tpu.memory_space<semaphore_mem>> -> memref<1x!tpu.dma_semaphore, #tpu.memory_space<semaphore_mem>>
    %77 = tpu.memref_squeeze %76 : memref<1x!tpu.dma_semaphore, #tpu.memory_space<semaphore_mem>> -> memref<!tpu.dma_semaphore, #tpu.memory_space<semaphore_mem>>
    tpu.enqueue_dma source(%74 : memref<1x32xf32, #tpu.memory_space<any>>) target(%75 : memref<1x32xf32, #tpu.memory_space<vmem>>) target_semaphore(%77 : memref<!tpu.dma_semaphore, #tpu.memory_space<semaphore_mem>>)
    %c1_i32 = arith.constant 1 : i32
    %c0_i32_66 = arith.constant 0 : i32
    %78 = tpu.memref_slice %arg5[%7, %c0_i32_66] : memref<101x32xf32, #tpu.memory_space<any>> -> memref<1x32xf32, #tpu.memory_space<any>>
    %c0_i32_67 = arith.constant 0 : i32
    %c0_i32_68 = arith.constant 0 : i32
    %79 = tpu.memref_slice %arg8[%c0_i32_67, %c0_i32_68] : memref<128x32xf32, #tpu.memory_space<vmem>> -> memref<1x32xf32, #tpu.memory_space<vmem>>
    %80 = tpu.memref_slice %arg9[%c1_i32] : memref<3x!tpu.dma_semaphore, #tpu.memory_space<semaphore_mem>> -> memref<1x!tpu.dma_semaphore, #tpu.memory_space<semaphore_mem>>
    %81 = tpu.memref_squeeze %80 : memref<1x!tpu.dma_semaphore, #tpu.memory_space<semaphore_mem>> -> memref<!tpu.dma_semaphore, #tpu.memory_space<semaphore_mem>>
    tpu.enqueue_dma source(%78 : memref<1x32xf32, #tpu.memory_space<any>>) target(%79 : memref<1x32xf32, #tpu.memory_space<vmem>>) target_semaphore(%81 : memref<!tpu.dma_semaphore, #tpu.memory_space<semaphore_mem>>)
    %c2_i32 = arith.constant 2 : i32
    %c0_i32_69 = arith.constant 0 : i32
    %82 = tpu.memref_slice %arg5[%10, %c0_i32_69] : memref<101x32xf32, #tpu.memory_space<any>> -> memref<1x32xf32, #tpu.memory_space<any>>
    %c8_i32 = arith.constant 8 : i32
    %c0_i32_70 = arith.constant 0 : i32
    %83 = tpu.memref_slice %arg8[%c8_i32, %c0_i32_70] : memref<128x32xf32, #tpu.memory_space<vmem>> -> memref<1x32xf32, #tpu.memory_space<vmem>>
    %84 = tpu.memref_slice %arg9[%c2_i32] : memref<3x!tpu.dma_semaphore, #tpu.memory_space<semaphore_mem>> -> memref<1x!tpu.dma_semaphore, #tpu.memory_space<semaphore_mem>>
    %85 = tpu.memref_squeeze %84 : memref<1x!tpu.dma_semaphore, #tpu.memory_space<semaphore_mem>> -> memref<!tpu.dma_semaphore, #tpu.memory_space<semaphore_mem>>
    tpu.enqueue_dma source(%82 : memref<1x32xf32, #tpu.memory_space<any>>) target(%83 : memref<1x32xf32, #tpu.memory_space<vmem>>) target_semaphore(%85 : memref<!tpu.dma_semaphore, #tpu.memory_space<semaphore_mem>>)
    %c0_i32_71 = arith.constant 0 : i32
    %c0_i32_72 = arith.constant 0 : i32
    %86 = tpu.memref_slice %arg4[%13, %c0_i32_72] : memref<51x32xf32, #tpu.memory_space<any>> -> memref<1x32xf32, #tpu.memory_space<any>>
    %c1_i32_73 = arith.constant 1 : i32
    %c0_i32_74 = arith.constant 0 : i32
    %87 = tpu.memref_slice %arg7[%c1_i32_73, %c0_i32_74] : memref<8x32xf32, #tpu.memory_space<vmem>> -> memref<1x32xf32, #tpu.memory_space<vmem>>
    %88 = tpu.memref_slice %arg9[%c0_i32_71] : memref<3x!tpu.dma_semaphore, #tpu.memory_space<semaphore_mem>> -> memref<1x!tpu.dma_semaphore, #tpu.memory_space<semaphore_mem>>
    %89 = tpu.memref_squeeze %88 : memref<1x!tpu.dma_semaphore, #tpu.memory_space<semaphore_mem>> -> memref<!tpu.dma_semaphore, #tpu.memory_space<semaphore_mem>>
    tpu.enqueue_dma source(%86 : memref<1x32xf32, #tpu.memory_space<any>>) target(%87 : memref<1x32xf32, #tpu.memory_space<vmem>>) target_semaphore(%89 : memref<!tpu.dma_semaphore, #tpu.memory_space<semaphore_mem>>)
    %c1_i32_75 = arith.constant 1 : i32
    %c0_i32_76 = arith.constant 0 : i32
    %90 = tpu.memref_slice %arg5[%16, %c0_i32_76] : memref<101x32xf32, #tpu.memory_space<any>> -> memref<1x32xf32, #tpu.memory_space<any>>
    %c1_i32_77 = arith.constant 1 : i32
    %c0_i32_78 = arith.constant 0 : i32
    %91 = tpu.memref_slice %arg8[%c1_i32_77, %c0_i32_78] : memref<128x32xf32, #tpu.memory_space<vmem>> -> memref<1x32xf32, #tpu.memory_space<vmem>>
    %92 = tpu.memref_slice %arg9[%c1_i32_75] : memref<3x!tpu.dma_semaphore, #tpu.memory_space<semaphore_mem>> -> memref<1x!tpu.dma_semaphore, #tpu.memory_space<semaphore_mem>>
    %93 = tpu.memref_squeeze %92 : memref<1x!tpu.dma_semaphore, #tpu.memory_space<semaphore_mem>> -> memref<!tpu.dma_semaphore, #tpu.memory_space<semaphore_mem>>
    tpu.enqueue_dma source(%90 : memref<1x32xf32, #tpu.memory_space<any>>) target(%91 : memref<1x32xf32, #tpu.memory_space<vmem>>) target_semaphore(%93 : memref<!tpu.dma_semaphore, #tpu.memory_space<semaphore_mem>>)
    %c2_i32_79 = arith.constant 2 : i32
    %c0_i32_80 = arith.constant 0 : i32
    %94 = tpu.memref_slice %arg5[%19, %c0_i32_80] : memref<101x32xf32, #tpu.memory_space<any>> -> memref<1x32xf32, #tpu.memory_space<any>>
    %c9_i32 = arith.constant 9 : i32
    %c0_i32_81 = arith.constant 0 : i32
    %95 = tpu.memref_slice %arg8[%c9_i32, %c0_i32_81] : memref<128x32xf32, #tpu.memory_space<vmem>> -> memref<1x32xf32, #tpu.memory_space<vmem>>
    %96 = tpu.memref_slice %arg9[%c2_i32_79] : memref<3x!tpu.dma_semaphore, #tpu.memory_space<semaphore_mem>> -> memref<1x!tpu.dma_semaphore, #tpu.memory_space<semaphore_mem>>
    %97 = tpu.memref_squeeze %96 : memref<1x!tpu.dma_semaphore, #tpu.memory_space<semaphore_mem>> -> memref<!tpu.dma_semaphore, #tpu.memory_space<semaphore_mem>>
    tpu.enqueue_dma source(%94 : memref<1x32xf32, #tpu.memory_space<any>>) target(%95 : memref<1x32xf32, #tpu.memory_space<vmem>>) target_semaphore(%97 : memref<!tpu.dma_semaphore, #tpu.memory_space<semaphore_mem>>)
    %c0_i32_82 = arith.constant 0 : i32
    %c0_i32_83 = arith.constant 0 : i32
    %98 = tpu.memref_slice %arg4[%22, %c0_i32_83] : memref<51x32xf32, #tpu.memory_space<any>> -> memref<1x32xf32, #tpu.memory_space<any>>
    %c2_i32_84 = arith.constant 2 : i32
    %c0_i32_85 = arith.constant 0 : i32
    %99 = tpu.memref_slice %arg7[%c2_i32_84, %c0_i32_85] : memref<8x32xf32, #tpu.memory_space<vmem>> -> memref<1x32xf32, #tpu.memory_space<vmem>>
    %100 = tpu.memref_slice %arg9[%c0_i32_82] : memref<3x!tpu.dma_semaphore, #tpu.memory_space<semaphore_mem>> -> memref<1x!tpu.dma_semaphore, #tpu.memory_space<semaphore_mem>>
    %101 = tpu.memref_squeeze %100 : memref<1x!tpu.dma_semaphore, #tpu.memory_space<semaphore_mem>> -> memref<!tpu.dma_semaphore, #tpu.memory_space<semaphore_mem>>
    tpu.enqueue_dma source(%98 : memref<1x32xf32, #tpu.memory_space<any>>) target(%99 : memref<1x32xf32, #tpu.memory_space<vmem>>) target_semaphore(%101 : memref<!tpu.dma_semaphore, #tpu.memory_space<semaphore_mem>>)
    %c1_i32_86 = arith.constant 1 : i32
    %c0_i32_87 = arith.constant 0 : i32
    %102 = tpu.memref_slice %arg5[%25, %c0_i32_87] : memref<101x32xf32, #tpu.memory_space<any>> -> memref<1x32xf32, #tpu.memory_space<any>>
    %c2_i32_88 = arith.constant 2 : i32
    %c0_i32_89 = arith.constant 0 : i32
    %103 = tpu.memref_slice %arg8[%c2_i32_88, %c0_i32_89] : memref<128x32xf32, #tpu.memory_space<vmem>> -> memref<1x32xf32, #tpu.memory_space<vmem>>
    %104 = tpu.memref_slice %arg9[%c1_i32_86] : memref<3x!tpu.dma_semaphore, #tpu.memory_space<semaphore_mem>> -> memref<1x!tpu.dma_semaphore, #tpu.memory_space<semaphore_mem>>
    %105 = tpu.memref_squeeze %104 : memref<1x!tpu.dma_semaphore, #tpu.memory_space<semaphore_mem>> -> memref<!tpu.dma_semaphore, #tpu.memory_space<semaphore_mem>>
    tpu.enqueue_dma source(%102 : memref<1x32xf32, #tpu.memory_space<any>>) target(%103 : memref<1x32xf32, #tpu.memory_space<vmem>>) target_semaphore(%105 : memref<!tpu.dma_semaphore, #tpu.memory_space<semaphore_mem>>)
    %c2_i32_90 = arith.constant 2 : i32
    %c0_i32_91 = arith.constant 0 : i32
    %106 = tpu.memref_slice %arg5[%28, %c0_i32_91] : memref<101x32xf32, #tpu.memory_space<any>> -> memref<1x32xf32, #tpu.memory_space<any>>
    %c10_i32 = arith.constant 10 : i32
    %c0_i32_92 = arith.constant 0 : i32
    %107 = tpu.memref_slice %arg8[%c10_i32, %c0_i32_92] : memref<128x32xf32, #tpu.memory_space<vmem>> -> memref<1x32xf32, #tpu.memory_space<vmem>>
    %108 = tpu.memref_slice %arg9[%c2_i32_90] : memref<3x!tpu.dma_semaphore, #tpu.memory_space<semaphore_mem>> -> memref<1x!tpu.dma_semaphore, #tpu.memory_space<semaphore_mem>>
    %109 = tpu.memref_squeeze %108 : memref<1x!tpu.dma_semaphore, #tpu.memory_space<semaphore_mem>> -> memref<!tpu.dma_semaphore, #tpu.memory_space<semaphore_mem>>
    tpu.enqueue_dma source(%106 : memref<1x32xf32, #tpu.memory_space<any>>) target(%107 : memref<1x32xf32, #tpu.memory_space<vmem>>) target_semaphore(%109 : memref<!tpu.dma_semaphore, #tpu.memory_space<semaphore_mem>>)
    %c0_i32_93 = arith.constant 0 : i32
    %c0_i32_94 = arith.constant 0 : i32
    %110 = tpu.memref_slice %arg4[%31, %c0_i32_94] : memref<51x32xf32, #tpu.memory_space<any>> -> memref<1x32xf32, #tpu.memory_space<any>>
    %c3_i32 = arith.constant 3 : i32
    %c0_i32_95 = arith.constant 0 : i32
    %111 = tpu.memref_slice %arg7[%c3_i32, %c0_i32_95] : memref<8x32xf32, #tpu.memory_space<vmem>> -> memref<1x32xf32, #tpu.memory_space<vmem>>
    %112 = tpu.memref_slice %arg9[%c0_i32_93] : memref<3x!tpu.dma_semaphore, #tpu.memory_space<semaphore_mem>> -> memref<1x!tpu.dma_semaphore, #tpu.memory_space<semaphore_mem>>
    %113 = tpu.memref_squeeze %112 : memref<1x!tpu.dma_semaphore, #tpu.memory_space<semaphore_mem>> -> memref<!tpu.dma_semaphore, #tpu.memory_space<semaphore_mem>>
    tpu.enqueue_dma source(%110 : memref<1x32xf32, #tpu.memory_space<any>>) target(%111 : memref<1x32xf32, #tpu.memory_space<vmem>>) target_semaphore(%113 : memref<!tpu.dma_semaphore, #tpu.memory_space<semaphore_mem>>)
    %c1_i32_96 = arith.constant 1 : i32
    %c0_i32_97 = arith.constant 0 : i32
    %114 = tpu.memref_slice %arg5[%34, %c0_i32_97] : memref<101x32xf32, #tpu.memory_space<any>> -> memref<1x32xf32, #tpu.memory_space<any>>
    %c3_i32_98 = arith.constant 3 : i32
    %c0_i32_99 = arith.constant 0 : i32
    %115 = tpu.memref_slice %arg8[%c3_i32_98, %c0_i32_99] : memref<128x32xf32, #tpu.memory_space<vmem>> -> memref<1x32xf32, #tpu.memory_space<vmem>>
    %116 = tpu.memref_slice %arg9[%c1_i32_96] : memref<3x!tpu.dma_semaphore, #tpu.memory_space<semaphore_mem>> -> memref<1x!tpu.dma_semaphore, #tpu.memory_space<semaphore_mem>>
    %117 = tpu.memref_squeeze %116 : memref<1x!tpu.dma_semaphore, #tpu.memory_space<semaphore_mem>> -> memref<!tpu.dma_semaphore, #tpu.memory_space<semaphore_mem>>
    tpu.enqueue_dma source(%114 : memref<1x32xf32, #tpu.memory_space<any>>) target(%115 : memref<1x32xf32, #tpu.memory_space<vmem>>) target_semaphore(%117 : memref<!tpu.dma_semaphore, #tpu.memory_space<semaphore_mem>>)
    %c2_i32_100 = arith.constant 2 : i32
    %c0_i32_101 = arith.constant 0 : i32
    %118 = tpu.memref_slice %arg5[%37, %c0_i32_101] : memref<101x32xf32, #tpu.memory_space<any>> -> memref<1x32xf32, #tpu.memory_space<any>>
    %c11_i32 = arith.constant 11 : i32
    %c0_i32_102 = arith.constant 0 : i32
    %119 = tpu.memref_slice %arg8[%c11_i32, %c0_i32_102] : memref<128x32xf32, #tpu.memory_space<vmem>> -> memref<1x32xf32, #tpu.memory_space<vmem>>
    %120 = tpu.memref_slice %arg9[%c2_i32_100] : memref<3x!tpu.dma_semaphore, #tpu.memory_space<semaphore_mem>> -> memref<1x!tpu.dma_semaphore, #tpu.memory_space<semaphore_mem>>
    %121 = tpu.memref_squeeze %120 : memref<1x!tpu.dma_semaphore, #tpu.memory_space<semaphore_mem>> -> memref<!tpu.dma_semaphore, #tpu.memory_space<semaphore_mem>>
    tpu.enqueue_dma source(%118 : memref<1x32xf32, #tpu.memory_space<any>>) target(%119 : memref<1x32xf32, #tpu.memory_space<vmem>>) target_semaphore(%121 : memref<!tpu.dma_semaphore, #tpu.memory_space<semaphore_mem>>)
    %c0_i32_103 = arith.constant 0 : i32
    %c0_i32_104 = arith.constant 0 : i32
    %122 = tpu.memref_slice %arg4[%40, %c0_i32_104] : memref<51x32xf32, #tpu.memory_space<any>> -> memref<1x32xf32, #tpu.memory_space<any>>
    %c4_i32 = arith.constant 4 : i32
    %c0_i32_105 = arith.constant 0 : i32
    %123 = tpu.memref_slice %arg7[%c4_i32, %c0_i32_105] : memref<8x32xf32, #tpu.memory_space<vmem>> -> memref<1x32xf32, #tpu.memory_space<vmem>>
    %124 = tpu.memref_slice %arg9[%c0_i32_103] : memref<3x!tpu.dma_semaphore, #tpu.memory_space<semaphore_mem>> -> memref<1x!tpu.dma_semaphore, #tpu.memory_space<semaphore_mem>>
    %125 = tpu.memref_squeeze %124 : memref<1x!tpu.dma_semaphore, #tpu.memory_space<semaphore_mem>> -> memref<!tpu.dma_semaphore, #tpu.memory_space<semaphore_mem>>
    tpu.enqueue_dma source(%122 : memref<1x32xf32, #tpu.memory_space<any>>) target(%123 : memref<1x32xf32, #tpu.memory_space<vmem>>) target_semaphore(%125 : memref<!tpu.dma_semaphore, #tpu.memory_space<semaphore_mem>>)
    %c1_i32_106 = arith.constant 1 : i32
    %c0_i32_107 = arith.constant 0 : i32
    %126 = tpu.memref_slice %arg5[%43, %c0_i32_107] : memref<101x32xf32, #tpu.memory_space<any>> -> memref<1x32xf32, #tpu.memory_space<any>>
    %c4_i32_108 = arith.constant 4 : i32
    %c0_i32_109 = arith.constant 0 : i32
    %127 = tpu.memref_slice %arg8[%c4_i32_108, %c0_i32_109] : memref<128x32xf32, #tpu.memory_space<vmem>> -> memref<1x32xf32, #tpu.memory_space<vmem>>
    %128 = tpu.memref_slice %arg9[%c1_i32_106] : memref<3x!tpu.dma_semaphore, #tpu.memory_space<semaphore_mem>> -> memref<1x!tpu.dma_semaphore, #tpu.memory_space<semaphore_mem>>
    %129 = tpu.memref_squeeze %128 : memref<1x!tpu.dma_semaphore, #tpu.memory_space<semaphore_mem>> -> memref<!tpu.dma_semaphore, #tpu.memory_space<semaphore_mem>>
    tpu.enqueue_dma source(%126 : memref<1x32xf32, #tpu.memory_space<any>>) target(%127 : memref<1x32xf32, #tpu.memory_space<vmem>>) target_semaphore(%129 : memref<!tpu.dma_semaphore, #tpu.memory_space<semaphore_mem>>)
    %c2_i32_110 = arith.constant 2 : i32
    %c0_i32_111 = arith.constant 0 : i32
    %130 = tpu.memref_slice %arg5[%46, %c0_i32_111] : memref<101x32xf32, #tpu.memory_space<any>> -> memref<1x32xf32, #tpu.memory_space<any>>
    %c12_i32 = arith.constant 12 : i32
    %c0_i32_112 = arith.constant 0 : i32
    %131 = tpu.memref_slice %arg8[%c12_i32, %c0_i32_112] : memref<128x32xf32, #tpu.memory_space<vmem>> -> memref<1x32xf32, #tpu.memory_space<vmem>>
    %132 = tpu.memref_slice %arg9[%c2_i32_110] : memref<3x!tpu.dma_semaphore, #tpu.memory_space<semaphore_mem>> -> memref<1x!tpu.dma_semaphore, #tpu.memory_space<semaphore_mem>>
    %133 = tpu.memref_squeeze %132 : memref<1x!tpu.dma_semaphore, #tpu.memory_space<semaphore_mem>> -> memref<!tpu.dma_semaphore, #tpu.memory_space<semaphore_mem>>
    tpu.enqueue_dma source(%130 : memref<1x32xf32, #tpu.memory_space<any>>) target(%131 : memref<1x32xf32, #tpu.memory_space<vmem>>) target_semaphore(%133 : memref<!tpu.dma_semaphore, #tpu.memory_space<semaphore_mem>>)
    %c0_i32_113 = arith.constant 0 : i32
    %c0_i32_114 = arith.constant 0 : i32
    %134 = tpu.memref_slice %arg4[%49, %c0_i32_114] : memref<51x32xf32, #tpu.memory_space<any>> -> memref<1x32xf32, #tpu.memory_space<any>>
    %c5_i32 = arith.constant 5 : i32
    %c0_i32_115 = arith.constant 0 : i32
    %135 = tpu.memref_slice %arg7[%c5_i32, %c0_i32_115] : memref<8x32xf32, #tpu.memory_space<vmem>> -> memref<1x32xf32, #tpu.memory_space<vmem>>
    %136 = tpu.memref_slice %arg9[%c0_i32_113] : memref<3x!tpu.dma_semaphore, #tpu.memory_space<semaphore_mem>> -> memref<1x!tpu.dma_semaphore, #tpu.memory_space<semaphore_mem>>
    %137 = tpu.memref_squeeze %136 : memref<1x!tpu.dma_semaphore, #tpu.memory_space<semaphore_mem>> -> memref<!tpu.dma_semaphore, #tpu.memory_space<semaphore_mem>>
    tpu.enqueue_dma source(%134 : memref<1x32xf32, #tpu.memory_space<any>>) target(%135 : memref<1x32xf32, #tpu.memory_space<vmem>>) target_semaphore(%137 : memref<!tpu.dma_semaphore, #tpu.memory_space<semaphore_mem>>)
    %c1_i32_116 = arith.constant 1 : i32
    %c0_i32_117 = arith.constant 0 : i32
    %138 = tpu.memref_slice %arg5[%52, %c0_i32_117] : memref<101x32xf32, #tpu.memory_space<any>> -> memref<1x32xf32, #tpu.memory_space<any>>
    %c5_i32_118 = arith.constant 5 : i32
    %c0_i32_119 = arith.constant 0 : i32
    %139 = tpu.memref_slice %arg8[%c5_i32_118, %c0_i32_119] : memref<128x32xf32, #tpu.memory_space<vmem>> -> memref<1x32xf32, #tpu.memory_space<vmem>>
    %140 = tpu.memref_slice %arg9[%c1_i32_116] : memref<3x!tpu.dma_semaphore, #tpu.memory_space<semaphore_mem>> -> memref<1x!tpu.dma_semaphore, #tpu.memory_space<semaphore_mem>>
    %141 = tpu.memref_squeeze %140 : memref<1x!tpu.dma_semaphore, #tpu.memory_space<semaphore_mem>> -> memref<!tpu.dma_semaphore, #tpu.memory_space<semaphore_mem>>
    tpu.enqueue_dma source(%138 : memref<1x32xf32, #tpu.memory_space<any>>) target(%139 : memref<1x32xf32, #tpu.memory_space<vmem>>) target_semaphore(%141 : memref<!tpu.dma_semaphore, #tpu.memory_space<semaphore_mem>>)
    %c2_i32_120 = arith.constant 2 : i32
    %c0_i32_121 = arith.constant 0 : i32
    %142 = tpu.memref_slice %arg5[%55, %c0_i32_121] : memref<101x32xf32, #tpu.memory_space<any>> -> memref<1x32xf32, #tpu.memory_space<any>>
    %c13_i32 = arith.constant 13 : i32
    %c0_i32_122 = arith.constant 0 : i32
    %143 = tpu.memref_slice %arg8[%c13_i32, %c0_i32_122] : memref<128x32xf32, #tpu.memory_space<vmem>> -> memref<1x32xf32, #tpu.memory_space<vmem>>
    %144 = tpu.memref_slice %arg9[%c2_i32_120] : memref<3x!tpu.dma_semaphore, #tpu.memory_space<semaphore_mem>> -> memref<1x!tpu.dma_semaphore, #tpu.memory_space<semaphore_mem>>
    %145 = tpu.memref_squeeze %144 : memref<1x!tpu.dma_semaphore, #tpu.memory_space<semaphore_mem>> -> memref<!tpu.dma_semaphore, #tpu.memory_space<semaphore_mem>>
    tpu.enqueue_dma source(%142 : memref<1x32xf32, #tpu.memory_space<any>>) target(%143 : memref<1x32xf32, #tpu.memory_space<vmem>>) target_semaphore(%145 : memref<!tpu.dma_semaphore, #tpu.memory_space<semaphore_mem>>)
    %c0_i32_123 = arith.constant 0 : i32
    %c0_i32_124 = arith.constant 0 : i32
    %146 = tpu.memref_slice %arg4[%58, %c0_i32_124] : memref<51x32xf32, #tpu.memory_space<any>> -> memref<1x32xf32, #tpu.memory_space<any>>
    %c6_i32 = arith.constant 6 : i32
    %c0_i32_125 = arith.constant 0 : i32
    %147 = tpu.memref_slice %arg7[%c6_i32, %c0_i32_125] : memref<8x32xf32, #tpu.memory_space<vmem>> -> memref<1x32xf32, #tpu.memory_space<vmem>>
    %148 = tpu.memref_slice %arg9[%c0_i32_123] : memref<3x!tpu.dma_semaphore, #tpu.memory_space<semaphore_mem>> -> memref<1x!tpu.dma_semaphore, #tpu.memory_space<semaphore_mem>>
    %149 = tpu.memref_squeeze %148 : memref<1x!tpu.dma_semaphore, #tpu.memory_space<semaphore_mem>> -> memref<!tpu.dma_semaphore, #tpu.memory_space<semaphore_mem>>
    tpu.enqueue_dma source(%146 : memref<1x32xf32, #tpu.memory_space<any>>) target(%147 : memref<1x32xf32, #tpu.memory_space<vmem>>) target_semaphore(%149 : memref<!tpu.dma_semaphore, #tpu.memory_space<semaphore_mem>>)
    %c1_i32_126 = arith.constant 1 : i32
    %c0_i32_127 = arith.constant 0 : i32
    %150 = tpu.memref_slice %arg5[%61, %c0_i32_127] : memref<101x32xf32, #tpu.memory_space<any>> -> memref<1x32xf32, #tpu.memory_space<any>>
    %c6_i32_128 = arith.constant 6 : i32
    %c0_i32_129 = arith.constant 0 : i32
    %151 = tpu.memref_slice %arg8[%c6_i32_128, %c0_i32_129] : memref<128x32xf32, #tpu.memory_space<vmem>> -> memref<1x32xf32, #tpu.memory_space<vmem>>
    %152 = tpu.memref_slice %arg9[%c1_i32_126] : memref<3x!tpu.dma_semaphore, #tpu.memory_space<semaphore_mem>> -> memref<1x!tpu.dma_semaphore, #tpu.memory_space<semaphore_mem>>
    %153 = tpu.memref_squeeze %152 : memref<1x!tpu.dma_semaphore, #tpu.memory_space<semaphore_mem>> -> memref<!tpu.dma_semaphore, #tpu.memory_space<semaphore_mem>>
    tpu.enqueue_dma source(%150 : memref<1x32xf32, #tpu.memory_space<any>>) target(%151 : memref<1x32xf32, #tpu.memory_space<vmem>>) target_semaphore(%153 : memref<!tpu.dma_semaphore, #tpu.memory_space<semaphore_mem>>)
    %c2_i32_130 = arith.constant 2 : i32
    %c0_i32_131 = arith.constant 0 : i32
    %154 = tpu.memref_slice %arg5[%64, %c0_i32_131] : memref<101x32xf32, #tpu.memory_space<any>> -> memref<1x32xf32, #tpu.memory_space<any>>
    %c14_i32 = arith.constant 14 : i32
    %c0_i32_132 = arith.constant 0 : i32
    %155 = tpu.memref_slice %arg8[%c14_i32, %c0_i32_132] : memref<128x32xf32, #tpu.memory_space<vmem>> -> memref<1x32xf32, #tpu.memory_space<vmem>>
    %156 = tpu.memref_slice %arg9[%c2_i32_130] : memref<3x!tpu.dma_semaphore, #tpu.memory_space<semaphore_mem>> -> memref<1x!tpu.dma_semaphore, #tpu.memory_space<semaphore_mem>>
    %157 = tpu.memref_squeeze %156 : memref<1x!tpu.dma_semaphore, #tpu.memory_space<semaphore_mem>> -> memref<!tpu.dma_semaphore, #tpu.memory_space<semaphore_mem>>
    tpu.enqueue_dma source(%154 : memref<1x32xf32, #tpu.memory_space<any>>) target(%155 : memref<1x32xf32, #tpu.memory_space<vmem>>) target_semaphore(%157 : memref<!tpu.dma_semaphore, #tpu.memory_space<semaphore_mem>>)
    %c0_i32_133 = arith.constant 0 : i32
    %c0_i32_134 = arith.constant 0 : i32
    %158 = tpu.memref_slice %arg4[%67, %c0_i32_134] : memref<51x32xf32, #tpu.memory_space<any>> -> memref<1x32xf32, #tpu.memory_space<any>>
    %c7_i32 = arith.constant 7 : i32
    %c0_i32_135 = arith.constant 0 : i32
    %159 = tpu.memref_slice %arg7[%c7_i32, %c0_i32_135] : memref<8x32xf32, #tpu.memory_space<vmem>> -> memref<1x32xf32, #tpu.memory_space<vmem>>
    %160 = tpu.memref_slice %arg9[%c0_i32_133] : memref<3x!tpu.dma_semaphore, #tpu.memory_space<semaphore_mem>> -> memref<1x!tpu.dma_semaphore, #tpu.memory_space<semaphore_mem>>
    %161 = tpu.memref_squeeze %160 : memref<1x!tpu.dma_semaphore, #tpu.memory_space<semaphore_mem>> -> memref<!tpu.dma_semaphore, #tpu.memory_space<semaphore_mem>>
    tpu.enqueue_dma source(%158 : memref<1x32xf32, #tpu.memory_space<any>>) target(%159 : memref<1x32xf32, #tpu.memory_space<vmem>>) target_semaphore(%161 : memref<!tpu.dma_semaphore, #tpu.memory_space<semaphore_mem>>)
    %c1_i32_136 = arith.constant 1 : i32
    %c0_i32_137 = arith.constant 0 : i32
    %162 = tpu.memref_slice %arg5[%70, %c0_i32_137] : memref<101x32xf32, #tpu.memory_space<any>> -> memref<1x32xf32, #tpu.memory_space<any>>
    %c7_i32_138 = arith.constant 7 : i32
    %c0_i32_139 = arith.constant 0 : i32
    %163 = tpu.memref_slice %arg8[%c7_i32_138, %c0_i32_139] : memref<128x32xf32, #tpu.memory_space<vmem>> -> memref<1x32xf32, #tpu.memory_space<vmem>>
    %164 = tpu.memref_slice %arg9[%c1_i32_136] : memref<3x!tpu.dma_semaphore, #tpu.memory_space<semaphore_mem>> -> memref<1x!tpu.dma_semaphore, #tpu.memory_space<semaphore_mem>>
    %165 = tpu.memref_squeeze %164 : memref<1x!tpu.dma_semaphore, #tpu.memory_space<semaphore_mem>> -> memref<!tpu.dma_semaphore, #tpu.memory_space<semaphore_mem>>
    tpu.enqueue_dma source(%162 : memref<1x32xf32, #tpu.memory_space<any>>) target(%163 : memref<1x32xf32, #tpu.memory_space<vmem>>) target_semaphore(%165 : memref<!tpu.dma_semaphore, #tpu.memory_space<semaphore_mem>>)
    %c2_i32_140 = arith.constant 2 : i32
    %c0_i32_141 = arith.constant 0 : i32
    %166 = tpu.memref_slice %arg5[%73, %c0_i32_141] : memref<101x32xf32, #tpu.memory_space<any>> -> memref<1x32xf32, #tpu.memory_space<any>>
    %c15_i32 = arith.constant 15 : i32
    %c0_i32_142 = arith.constant 0 : i32
    %167 = tpu.memref_slice %arg8[%c15_i32, %c0_i32_142] : memref<128x32xf32, #tpu.memory_space<vmem>> -> memref<1x32xf32, #tpu.memory_space<vmem>>
    %168 = tpu.memref_slice %arg9[%c2_i32_140] : memref<3x!tpu.dma_semaphore, #tpu.memory_space<semaphore_mem>> -> memref<1x!tpu.dma_semaphore, #tpu.memory_space<semaphore_mem>>
    %169 = tpu.memref_squeeze %168 : memref<1x!tpu.dma_semaphore, #tpu.memory_space<semaphore_mem>> -> memref<!tpu.dma_semaphore, #tpu.memory_space<semaphore_mem>>
    tpu.enqueue_dma source(%166 : memref<1x32xf32, #tpu.memory_space<any>>) target(%167 : memref<1x32xf32, #tpu.memory_space<vmem>>) target_semaphore(%169 : memref<!tpu.dma_semaphore, #tpu.memory_space<semaphore_mem>>)
    %c0_i32_143 = arith.constant 0 : i32
    %c0_i32_144 = arith.constant 0 : i32
    %170 = tpu.memref_slice %arg4[%4, %c0_i32_144] : memref<51x32xf32, #tpu.memory_space<any>> -> memref<1x32xf32, #tpu.memory_space<any>>
    %c0_i32_145 = arith.constant 0 : i32
    %c0_i32_146 = arith.constant 0 : i32
    %171 = tpu.memref_slice %arg7[%c0_i32_145, %c0_i32_146] : memref<8x32xf32, #tpu.memory_space<vmem>> -> memref<1x32xf32, #tpu.memory_space<vmem>>
    %172 = tpu.memref_slice %arg9[%c0_i32_143] : memref<3x!tpu.dma_semaphore, #tpu.memory_space<semaphore_mem>> -> memref<1x!tpu.dma_semaphore, #tpu.memory_space<semaphore_mem>>
    %173 = tpu.memref_squeeze %172 : memref<1x!tpu.dma_semaphore, #tpu.memory_space<semaphore_mem>> -> memref<!tpu.dma_semaphore, #tpu.memory_space<semaphore_mem>>
    tpu.wait_dma2 semaphore(%173 : memref<!tpu.dma_semaphore, #tpu.memory_space<semaphore_mem>>) src(%170 : memref<1x32xf32, #tpu.memory_space<any>>) dst(%171 : memref<1x32xf32, #tpu.memory_space<vmem>>)
    %c1_i32_147 = arith.constant 1 : i32
    %c0_i32_148 = arith.constant 0 : i32
    %174 = tpu.memref_slice %arg5[%7, %c0_i32_148] : memref<101x32xf32, #tpu.memory_space<any>> -> memref<1x32xf32, #tpu.memory_space<any>>
    %c0_i32_149 = arith.constant 0 : i32
    %c0_i32_150 = arith.constant 0 : i32
    %175 = tpu.memref_slice %arg8[%c0_i32_149, %c0_i32_150] : memref<128x32xf32, #tpu.memory_space<vmem>> -> memref<1x32xf32, #tpu.memory_space<vmem>>
    %176 = tpu.memref_slice %arg9[%c1_i32_147] : memref<3x!tpu.dma_semaphore, #tpu.memory_space<semaphore_mem>> -> memref<1x!tpu.dma_semaphore, #tpu.memory_space<semaphore_mem>>
    %177 = tpu.memref_squeeze %176 : memref<1x!tpu.dma_semaphore, #tpu.memory_space<semaphore_mem>> -> memref<!tpu.dma_semaphore, #tpu.memory_space<semaphore_mem>>
    tpu.wait_dma2 semaphore(%177 : memref<!tpu.dma_semaphore, #tpu.memory_space<semaphore_mem>>) src(%174 : memref<1x32xf32, #tpu.memory_space<any>>) dst(%175 : memref<1x32xf32, #tpu.memory_space<vmem>>)
    %c2_i32_151 = arith.constant 2 : i32
    %c0_i32_152 = arith.constant 0 : i32
    %178 = tpu.memref_slice %arg5[%10, %c0_i32_152] : memref<101x32xf32, #tpu.memory_space<any>> -> memref<1x32xf32, #tpu.memory_space<any>>
    %c8_i32_153 = arith.constant 8 : i32
    %c0_i32_154 = arith.constant 0 : i32
    %179 = tpu.memref_slice %arg8[%c8_i32_153, %c0_i32_154] : memref<128x32xf32, #tpu.memory_space<vmem>> -> memref<1x32xf32, #tpu.memory_space<vmem>>
    %180 = tpu.memref_slice %arg9[%c2_i32_151] : memref<3x!tpu.dma_semaphore, #tpu.memory_space<semaphore_mem>> -> memref<1x!tpu.dma_semaphore, #tpu.memory_space<semaphore_mem>>
    %181 = tpu.memref_squeeze %180 : memref<1x!tpu.dma_semaphore, #tpu.memory_space<semaphore_mem>> -> memref<!tpu.dma_semaphore, #tpu.memory_space<semaphore_mem>>
    tpu.wait_dma2 semaphore(%181 : memref<!tpu.dma_semaphore, #tpu.memory_space<semaphore_mem>>) src(%178 : memref<1x32xf32, #tpu.memory_space<any>>) dst(%179 : memref<1x32xf32, #tpu.memory_space<vmem>>)
    %c0_i32_155 = arith.constant 0 : i32
    %c0_i32_156 = arith.constant 0 : i32
    %182 = tpu.memref_slice %arg4[%13, %c0_i32_156] : memref<51x32xf32, #tpu.memory_space<any>> -> memref<1x32xf32, #tpu.memory_space<any>>
    %c1_i32_157 = arith.constant 1 : i32
    %c0_i32_158 = arith.constant 0 : i32
    %183 = tpu.memref_slice %arg7[%c1_i32_157, %c0_i32_158] : memref<8x32xf32, #tpu.memory_space<vmem>> -> memref<1x32xf32, #tpu.memory_space<vmem>>
    %184 = tpu.memref_slice %arg9[%c0_i32_155] : memref<3x!tpu.dma_semaphore, #tpu.memory_space<semaphore_mem>> -> memref<1x!tpu.dma_semaphore, #tpu.memory_space<semaphore_mem>>
    %185 = tpu.memref_squeeze %184 : memref<1x!tpu.dma_semaphore, #tpu.memory_space<semaphore_mem>> -> memref<!tpu.dma_semaphore, #tpu.memory_space<semaphore_mem>>
    tpu.wait_dma2 semaphore(%185 : memref<!tpu.dma_semaphore, #tpu.memory_space<semaphore_mem>>) src(%182 : memref<1x32xf32, #tpu.memory_space<any>>) dst(%183 : memref<1x32xf32, #tpu.memory_space<vmem>>)
    %c1_i32_159 = arith.constant 1 : i32
    %c0_i32_160 = arith.constant 0 : i32
    %186 = tpu.memref_slice %arg5[%16, %c0_i32_160] : memref<101x32xf32, #tpu.memory_space<any>> -> memref<1x32xf32, #tpu.memory_space<any>>
    %c1_i32_161 = arith.constant 1 : i32
    %c0_i32_162 = arith.constant 0 : i32
    %187 = tpu.memref_slice %arg8[%c1_i32_161, %c0_i32_162] : memref<128x32xf32, #tpu.memory_space<vmem>> -> memref<1x32xf32, #tpu.memory_space<vmem>>
    %188 = tpu.memref_slice %arg9[%c1_i32_159] : memref<3x!tpu.dma_semaphore, #tpu.memory_space<semaphore_mem>> -> memref<1x!tpu.dma_semaphore, #tpu.memory_space<semaphore_mem>>
    %189 = tpu.memref_squeeze %188 : memref<1x!tpu.dma_semaphore, #tpu.memory_space<semaphore_mem>> -> memref<!tpu.dma_semaphore, #tpu.memory_space<semaphore_mem>>
    tpu.wait_dma2 semaphore(%189 : memref<!tpu.dma_semaphore, #tpu.memory_space<semaphore_mem>>) src(%186 : memref<1x32xf32, #tpu.memory_space<any>>) dst(%187 : memref<1x32xf32, #tpu.memory_space<vmem>>)
    %c2_i32_163 = arith.constant 2 : i32
    %c0_i32_164 = arith.constant 0 : i32
    %190 = tpu.memref_slice %arg5[%19, %c0_i32_164] : memref<101x32xf32, #tpu.memory_space<any>> -> memref<1x32xf32, #tpu.memory_space<any>>
    %c9_i32_165 = arith.constant 9 : i32
    %c0_i32_166 = arith.constant 0 : i32
    %191 = tpu.memref_slice %arg8[%c9_i32_165, %c0_i32_166] : memref<128x32xf32, #tpu.memory_space<vmem>> -> memref<1x32xf32, #tpu.memory_space<vmem>>
    %192 = tpu.memref_slice %arg9[%c2_i32_163] : memref<3x!tpu.dma_semaphore, #tpu.memory_space<semaphore_mem>> -> memref<1x!tpu.dma_semaphore, #tpu.memory_space<semaphore_mem>>
    %193 = tpu.memref_squeeze %192 : memref<1x!tpu.dma_semaphore, #tpu.memory_space<semaphore_mem>> -> memref<!tpu.dma_semaphore, #tpu.memory_space<semaphore_mem>>
    tpu.wait_dma2 semaphore(%193 : memref<!tpu.dma_semaphore, #tpu.memory_space<semaphore_mem>>) src(%190 : memref<1x32xf32, #tpu.memory_space<any>>) dst(%191 : memref<1x32xf32, #tpu.memory_space<vmem>>)
    %c0_i32_167 = arith.constant 0 : i32
    %c0_i32_168 = arith.constant 0 : i32
    %194 = tpu.memref_slice %arg4[%22, %c0_i32_168] : memref<51x32xf32, #tpu.memory_space<any>> -> memref<1x32xf32, #tpu.memory_space<any>>
    %c2_i32_169 = arith.constant 2 : i32
    %c0_i32_170 = arith.constant 0 : i32
    %195 = tpu.memref_slice %arg7[%c2_i32_169, %c0_i32_170] : memref<8x32xf32, #tpu.memory_space<vmem>> -> memref<1x32xf32, #tpu.memory_space<vmem>>
    %196 = tpu.memref_slice %arg9[%c0_i32_167] : memref<3x!tpu.dma_semaphore, #tpu.memory_space<semaphore_mem>> -> memref<1x!tpu.dma_semaphore, #tpu.memory_space<semaphore_mem>>
    %197 = tpu.memref_squeeze %196 : memref<1x!tpu.dma_semaphore, #tpu.memory_space<semaphore_mem>> -> memref<!tpu.dma_semaphore, #tpu.memory_space<semaphore_mem>>
    tpu.wait_dma2 semaphore(%197 : memref<!tpu.dma_semaphore, #tpu.memory_space<semaphore_mem>>) src(%194 : memref<1x32xf32, #tpu.memory_space<any>>) dst(%195 : memref<1x32xf32, #tpu.memory_space<vmem>>)
    %c1_i32_171 = arith.constant 1 : i32
    %c0_i32_172 = arith.constant 0 : i32
    %198 = tpu.memref_slice %arg5[%25, %c0_i32_172] : memref<101x32xf32, #tpu.memory_space<any>> -> memref<1x32xf32, #tpu.memory_space<any>>
    %c2_i32_173 = arith.constant 2 : i32
    %c0_i32_174 = arith.constant 0 : i32
    %199 = tpu.memref_slice %arg8[%c2_i32_173, %c0_i32_174] : memref<128x32xf32, #tpu.memory_space<vmem>> -> memref<1x32xf32, #tpu.memory_space<vmem>>
    %200 = tpu.memref_slice %arg9[%c1_i32_171] : memref<3x!tpu.dma_semaphore, #tpu.memory_space<semaphore_mem>> -> memref<1x!tpu.dma_semaphore, #tpu.memory_space<semaphore_mem>>
    %201 = tpu.memref_squeeze %200 : memref<1x!tpu.dma_semaphore, #tpu.memory_space<semaphore_mem>> -> memref<!tpu.dma_semaphore, #tpu.memory_space<semaphore_mem>>
    tpu.wait_dma2 semaphore(%201 : memref<!tpu.dma_semaphore, #tpu.memory_space<semaphore_mem>>) src(%198 : memref<1x32xf32, #tpu.memory_space<any>>) dst(%199 : memref<1x32xf32, #tpu.memory_space<vmem>>)
    %c2_i32_175 = arith.constant 2 : i32
    %c0_i32_176 = arith.constant 0 : i32
    %202 = tpu.memref_slice %arg5[%28, %c0_i32_176] : memref<101x32xf32, #tpu.memory_space<any>> -> memref<1x32xf32, #tpu.memory_space<any>>
    %c10_i32_177 = arith.constant 10 : i32
    %c0_i32_178 = arith.constant 0 : i32
    %203 = tpu.memref_slice %arg8[%c10_i32_177, %c0_i32_178] : memref<128x32xf32, #tpu.memory_space<vmem>> -> memref<1x32xf32, #tpu.memory_space<vmem>>
    %204 = tpu.memref_slice %arg9[%c2_i32_175] : memref<3x!tpu.dma_semaphore, #tpu.memory_space<semaphore_mem>> -> memref<1x!tpu.dma_semaphore, #tpu.memory_space<semaphore_mem>>
    %205 = tpu.memref_squeeze %204 : memref<1x!tpu.dma_semaphore, #tpu.memory_space<semaphore_mem>> -> memref<!tpu.dma_semaphore, #tpu.memory_space<semaphore_mem>>
    tpu.wait_dma2 semaphore(%205 : memref<!tpu.dma_semaphore, #tpu.memory_space<semaphore_mem>>) src(%202 : memref<1x32xf32, #tpu.memory_space<any>>) dst(%203 : memref<1x32xf32, #tpu.memory_space<vmem>>)
    %c0_i32_179 = arith.constant 0 : i32
    %c0_i32_180 = arith.constant 0 : i32
    %206 = tpu.memref_slice %arg4[%31, %c0_i32_180] : memref<51x32xf32, #tpu.memory_space<any>> -> memref<1x32xf32, #tpu.memory_space<any>>
    %c3_i32_181 = arith.constant 3 : i32
    %c0_i32_182 = arith.constant 0 : i32
    %207 = tpu.memref_slice %arg7[%c3_i32_181, %c0_i32_182] : memref<8x32xf32, #tpu.memory_space<vmem>> -> memref<1x32xf32, #tpu.memory_space<vmem>>
    %208 = tpu.memref_slice %arg9[%c0_i32_179] : memref<3x!tpu.dma_semaphore, #tpu.memory_space<semaphore_mem>> -> memref<1x!tpu.dma_semaphore, #tpu.memory_space<semaphore_mem>>
    %209 = tpu.memref_squeeze %208 : memref<1x!tpu.dma_semaphore, #tpu.memory_space<semaphore_mem>> -> memref<!tpu.dma_semaphore, #tpu.memory_space<semaphore_mem>>
    tpu.wait_dma2 semaphore(%209 : memref<!tpu.dma_semaphore, #tpu.memory_space<semaphore_mem>>) src(%206 : memref<1x32xf32, #tpu.memory_space<any>>) dst(%207 : memref<1x32xf32, #tpu.memory_space<vmem>>)
    %c1_i32_183 = arith.constant 1 : i32
    %c0_i32_184 = arith.constant 0 : i32
    %210 = tpu.memref_slice %arg5[%34, %c0_i32_184] : memref<101x32xf32, #tpu.memory_space<any>> -> memref<1x32xf32, #tpu.memory_space<any>>
    %c3_i32_185 = arith.constant 3 : i32
    %c0_i32_186 = arith.constant 0 : i32
    %211 = tpu.memref_slice %arg8[%c3_i32_185, %c0_i32_186] : memref<128x32xf32, #tpu.memory_space<vmem>> -> memref<1x32xf32, #tpu.memory_space<vmem>>
    %212 = tpu.memref_slice %arg9[%c1_i32_183] : memref<3x!tpu.dma_semaphore, #tpu.memory_space<semaphore_mem>> -> memref<1x!tpu.dma_semaphore, #tpu.memory_space<semaphore_mem>>
    %213 = tpu.memref_squeeze %212 : memref<1x!tpu.dma_semaphore, #tpu.memory_space<semaphore_mem>> -> memref<!tpu.dma_semaphore, #tpu.memory_space<semaphore_mem>>
    tpu.wait_dma2 semaphore(%213 : memref<!tpu.dma_semaphore, #tpu.memory_space<semaphore_mem>>) src(%210 : memref<1x32xf32, #tpu.memory_space<any>>) dst(%211 : memref<1x32xf32, #tpu.memory_space<vmem>>)
    %c2_i32_187 = arith.constant 2 : i32
    %c0_i32_188 = arith.constant 0 : i32
    %214 = tpu.memref_slice %arg5[%37, %c0_i32_188] : memref<101x32xf32, #tpu.memory_space<any>> -> memref<1x32xf32, #tpu.memory_space<any>>
    %c11_i32_189 = arith.constant 11 : i32
    %c0_i32_190 = arith.constant 0 : i32
    %215 = tpu.memref_slice %arg8[%c11_i32_189, %c0_i32_190] : memref<128x32xf32, #tpu.memory_space<vmem>> -> memref<1x32xf32, #tpu.memory_space<vmem>>
    %216 = tpu.memref_slice %arg9[%c2_i32_187] : memref<3x!tpu.dma_semaphore, #tpu.memory_space<semaphore_mem>> -> memref<1x!tpu.dma_semaphore, #tpu.memory_space<semaphore_mem>>
    %217 = tpu.memref_squeeze %216 : memref<1x!tpu.dma_semaphore, #tpu.memory_space<semaphore_mem>> -> memref<!tpu.dma_semaphore, #tpu.memory_space<semaphore_mem>>
    tpu.wait_dma2 semaphore(%217 : memref<!tpu.dma_semaphore, #tpu.memory_space<semaphore_mem>>) src(%214 : memref<1x32xf32, #tpu.memory_space<any>>) dst(%215 : memref<1x32xf32, #tpu.memory_space<vmem>>)
    %c0_i32_191 = arith.constant 0 : i32
    %c0_i32_192 = arith.constant 0 : i32
    %218 = tpu.memref_slice %arg4[%40, %c0_i32_192] : memref<51x32xf32, #tpu.memory_space<any>> -> memref<1x32xf32, #tpu.memory_space<any>>
    %c4_i32_193 = arith.constant 4 : i32
    %c0_i32_194 = arith.constant 0 : i32
    %219 = tpu.memref_slice %arg7[%c4_i32_193, %c0_i32_194] : memref<8x32xf32, #tpu.memory_space<vmem>> -> memref<1x32xf32, #tpu.memory_space<vmem>>
    %220 = tpu.memref_slice %arg9[%c0_i32_191] : memref<3x!tpu.dma_semaphore, #tpu.memory_space<semaphore_mem>> -> memref<1x!tpu.dma_semaphore, #tpu.memory_space<semaphore_mem>>
    %221 = tpu.memref_squeeze %220 : memref<1x!tpu.dma_semaphore, #tpu.memory_space<semaphore_mem>> -> memref<!tpu.dma_semaphore, #tpu.memory_space<semaphore_mem>>
    tpu.wait_dma2 semaphore(%221 : memref<!tpu.dma_semaphore, #tpu.memory_space<semaphore_mem>>) src(%218 : memref<1x32xf32, #tpu.memory_space<any>>) dst(%219 : memref<1x32xf32, #tpu.memory_space<vmem>>)
    %c1_i32_195 = arith.constant 1 : i32
    %c0_i32_196 = arith.constant 0 : i32
    %222 = tpu.memref_slice %arg5[%43, %c0_i32_196] : memref<101x32xf32, #tpu.memory_space<any>> -> memref<1x32xf32, #tpu.memory_space<any>>
    %c4_i32_197 = arith.constant 4 : i32
    %c0_i32_198 = arith.constant 0 : i32
    %223 = tpu.memref_slice %arg8[%c4_i32_197, %c0_i32_198] : memref<128x32xf32, #tpu.memory_space<vmem>> -> memref<1x32xf32, #tpu.memory_space<vmem>>
    %224 = tpu.memref_slice %arg9[%c1_i32_195] : memref<3x!tpu.dma_semaphore, #tpu.memory_space<semaphore_mem>> -> memref<1x!tpu.dma_semaphore, #tpu.memory_space<semaphore_mem>>
    %225 = tpu.memref_squeeze %224 : memref<1x!tpu.dma_semaphore, #tpu.memory_space<semaphore_mem>> -> memref<!tpu.dma_semaphore, #tpu.memory_space<semaphore_mem>>
    tpu.wait_dma2 semaphore(%225 : memref<!tpu.dma_semaphore, #tpu.memory_space<semaphore_mem>>) src(%222 : memref<1x32xf32, #tpu.memory_space<any>>) dst(%223 : memref<1x32xf32, #tpu.memory_space<vmem>>)
    %c2_i32_199 = arith.constant 2 : i32
    %c0_i32_200 = arith.constant 0 : i32
    %226 = tpu.memref_slice %arg5[%46, %c0_i32_200] : memref<101x32xf32, #tpu.memory_space<any>> -> memref<1x32xf32, #tpu.memory_space<any>>
    %c12_i32_201 = arith.constant 12 : i32
    %c0_i32_202 = arith.constant 0 : i32
    %227 = tpu.memref_slice %arg8[%c12_i32_201, %c0_i32_202] : memref<128x32xf32, #tpu.memory_space<vmem>> -> memref<1x32xf32, #tpu.memory_space<vmem>>
    %228 = tpu.memref_slice %arg9[%c2_i32_199] : memref<3x!tpu.dma_semaphore, #tpu.memory_space<semaphore_mem>> -> memref<1x!tpu.dma_semaphore, #tpu.memory_space<semaphore_mem>>
    %229 = tpu.memref_squeeze %228 : memref<1x!tpu.dma_semaphore, #tpu.memory_space<semaphore_mem>> -> memref<!tpu.dma_semaphore, #tpu.memory_space<semaphore_mem>>
    tpu.wait_dma2 semaphore(%229 : memref<!tpu.dma_semaphore, #tpu.memory_space<semaphore_mem>>) src(%226 : memref<1x32xf32, #tpu.memory_space<any>>) dst(%227 : memref<1x32xf32, #tpu.memory_space<vmem>>)
    %c0_i32_203 = arith.constant 0 : i32
    %c0_i32_204 = arith.constant 0 : i32
    %230 = tpu.memref_slice %arg4[%49, %c0_i32_204] : memref<51x32xf32, #tpu.memory_space<any>> -> memref<1x32xf32, #tpu.memory_space<any>>
    %c5_i32_205 = arith.constant 5 : i32
    %c0_i32_206 = arith.constant 0 : i32
    %231 = tpu.memref_slice %arg7[%c5_i32_205, %c0_i32_206] : memref<8x32xf32, #tpu.memory_space<vmem>> -> memref<1x32xf32, #tpu.memory_space<vmem>>
    %232 = tpu.memref_slice %arg9[%c0_i32_203] : memref<3x!tpu.dma_semaphore, #tpu.memory_space<semaphore_mem>> -> memref<1x!tpu.dma_semaphore, #tpu.memory_space<semaphore_mem>>
    %233 = tpu.memref_squeeze %232 : memref<1x!tpu.dma_semaphore, #tpu.memory_space<semaphore_mem>> -> memref<!tpu.dma_semaphore, #tpu.memory_space<semaphore_mem>>
    tpu.wait_dma2 semaphore(%233 : memref<!tpu.dma_semaphore, #tpu.memory_space<semaphore_mem>>) src(%230 : memref<1x32xf32, #tpu.memory_space<any>>) dst(%231 : memref<1x32xf32, #tpu.memory_space<vmem>>)
    %c1_i32_207 = arith.constant 1 : i32
    %c0_i32_208 = arith.constant 0 : i32
    %234 = tpu.memref_slice %arg5[%52, %c0_i32_208] : memref<101x32xf32, #tpu.memory_space<any>> -> memref<1x32xf32, #tpu.memory_space<any>>
    %c5_i32_209 = arith.constant 5 : i32
    %c0_i32_210 = arith.constant 0 : i32
    %235 = tpu.memref_slice %arg8[%c5_i32_209, %c0_i32_210] : memref<128x32xf32, #tpu.memory_space<vmem>> -> memref<1x32xf32, #tpu.memory_space<vmem>>
    %236 = tpu.memref_slice %arg9[%c1_i32_207] : memref<3x!tpu.dma_semaphore, #tpu.memory_space<semaphore_mem>> -> memref<1x!tpu.dma_semaphore, #tpu.memory_space<semaphore_mem>>
    %237 = tpu.memref_squeeze %236 : memref<1x!tpu.dma_semaphore, #tpu.memory_space<semaphore_mem>> -> memref<!tpu.dma_semaphore, #tpu.memory_space<semaphore_mem>>
    tpu.wait_dma2 semaphore(%237 : memref<!tpu.dma_semaphore, #tpu.memory_space<semaphore_mem>>) src(%234 : memref<1x32xf32, #tpu.memory_space<any>>) dst(%235 : memref<1x32xf32, #tpu.memory_space<vmem>>)
    %c2_i32_211 = arith.constant 2 : i32
    %c0_i32_212 = arith.constant 0 : i32
    %238 = tpu.memref_slice %arg5[%55, %c0_i32_212] : memref<101x32xf32, #tpu.memory_space<any>> -> memref<1x32xf32, #tpu.memory_space<any>>
    %c13_i32_213 = arith.constant 13 : i32
    %c0_i32_214 = arith.constant 0 : i32
    %239 = tpu.memref_slice %arg8[%c13_i32_213, %c0_i32_214] : memref<128x32xf32, #tpu.memory_space<vmem>> -> memref<1x32xf32, #tpu.memory_space<vmem>>
    %240 = tpu.memref_slice %arg9[%c2_i32_211] : memref<3x!tpu.dma_semaphore, #tpu.memory_space<semaphore_mem>> -> memref<1x!tpu.dma_semaphore, #tpu.memory_space<semaphore_mem>>
    %241 = tpu.memref_squeeze %240 : memref<1x!tpu.dma_semaphore, #tpu.memory_space<semaphore_mem>> -> memref<!tpu.dma_semaphore, #tpu.memory_space<semaphore_mem>>
    tpu.wait_dma2 semaphore(%241 : memref<!tpu.dma_semaphore, #tpu.memory_space<semaphore_mem>>) src(%238 : memref<1x32xf32, #tpu.memory_space<any>>) dst(%239 : memref<1x32xf32, #tpu.memory_space<vmem>>)
    %c0_i32_215 = arith.constant 0 : i32
    %c0_i32_216 = arith.constant 0 : i32
    %242 = tpu.memref_slice %arg4[%58, %c0_i32_216] : memref<51x32xf32, #tpu.memory_space<any>> -> memref<1x32xf32, #tpu.memory_space<any>>
    %c6_i32_217 = arith.constant 6 : i32
    %c0_i32_218 = arith.constant 0 : i32
    %243 = tpu.memref_slice %arg7[%c6_i32_217, %c0_i32_218] : memref<8x32xf32, #tpu.memory_space<vmem>> -> memref<1x32xf32, #tpu.memory_space<vmem>>
    %244 = tpu.memref_slice %arg9[%c0_i32_215] : memref<3x!tpu.dma_semaphore, #tpu.memory_space<semaphore_mem>> -> memref<1x!tpu.dma_semaphore, #tpu.memory_space<semaphore_mem>>
    %245 = tpu.memref_squeeze %244 : memref<1x!tpu.dma_semaphore, #tpu.memory_space<semaphore_mem>> -> memref<!tpu.dma_semaphore, #tpu.memory_space<semaphore_mem>>
    tpu.wait_dma2 semaphore(%245 : memref<!tpu.dma_semaphore, #tpu.memory_space<semaphore_mem>>) src(%242 : memref<1x32xf32, #tpu.memory_space<any>>) dst(%243 : memref<1x32xf32, #tpu.memory_space<vmem>>)
    %c1_i32_219 = arith.constant 1 : i32
    %c0_i32_220 = arith.constant 0 : i32
    %246 = tpu.memref_slice %arg5[%61, %c0_i32_220] : memref<101x32xf32, #tpu.memory_space<any>> -> memref<1x32xf32, #tpu.memory_space<any>>
    %c6_i32_221 = arith.constant 6 : i32
    %c0_i32_222 = arith.constant 0 : i32
    %247 = tpu.memref_slice %arg8[%c6_i32_221, %c0_i32_222] : memref<128x32xf32, #tpu.memory_space<vmem>> -> memref<1x32xf32, #tpu.memory_space<vmem>>
    %248 = tpu.memref_slice %arg9[%c1_i32_219] : memref<3x!tpu.dma_semaphore, #tpu.memory_space<semaphore_mem>> -> memref<1x!tpu.dma_semaphore, #tpu.memory_space<semaphore_mem>>
    %249 = tpu.memref_squeeze %248 : memref<1x!tpu.dma_semaphore, #tpu.memory_space<semaphore_mem>> -> memref<!tpu.dma_semaphore, #tpu.memory_space<semaphore_mem>>
    tpu.wait_dma2 semaphore(%249 : memref<!tpu.dma_semaphore, #tpu.memory_space<semaphore_mem>>) src(%246 : memref<1x32xf32, #tpu.memory_space<any>>) dst(%247 : memref<1x32xf32, #tpu.memory_space<vmem>>)
    %c2_i32_223 = arith.constant 2 : i32
    %c0_i32_224 = arith.constant 0 : i32
    %250 = tpu.memref_slice %arg5[%64, %c0_i32_224] : memref<101x32xf32, #tpu.memory_space<any>> -> memref<1x32xf32, #tpu.memory_space<any>>
    %c14_i32_225 = arith.constant 14 : i32
    %c0_i32_226 = arith.constant 0 : i32
    %251 = tpu.memref_slice %arg8[%c14_i32_225, %c0_i32_226] : memref<128x32xf32, #tpu.memory_space<vmem>> -> memref<1x32xf32, #tpu.memory_space<vmem>>
    %252 = tpu.memref_slice %arg9[%c2_i32_223] : memref<3x!tpu.dma_semaphore, #tpu.memory_space<semaphore_mem>> -> memref<1x!tpu.dma_semaphore, #tpu.memory_space<semaphore_mem>>
    %253 = tpu.memref_squeeze %252 : memref<1x!tpu.dma_semaphore, #tpu.memory_space<semaphore_mem>> -> memref<!tpu.dma_semaphore, #tpu.memory_space<semaphore_mem>>
    tpu.wait_dma2 semaphore(%253 : memref<!tpu.dma_semaphore, #tpu.memory_space<semaphore_mem>>) src(%250 : memref<1x32xf32, #tpu.memory_space<any>>) dst(%251 : memref<1x32xf32, #tpu.memory_space<vmem>>)
    %c0_i32_227 = arith.constant 0 : i32
    %c0_i32_228 = arith.constant 0 : i32
    %254 = tpu.memref_slice %arg4[%67, %c0_i32_228] : memref<51x32xf32, #tpu.memory_space<any>> -> memref<1x32xf32, #tpu.memory_space<any>>
    %c7_i32_229 = arith.constant 7 : i32
    %c0_i32_230 = arith.constant 0 : i32
    %255 = tpu.memref_slice %arg7[%c7_i32_229, %c0_i32_230] : memref<8x32xf32, #tpu.memory_space<vmem>> -> memref<1x32xf32, #tpu.memory_space<vmem>>
    %256 = tpu.memref_slice %arg9[%c0_i32_227] : memref<3x!tpu.dma_semaphore, #tpu.memory_space<semaphore_mem>> -> memref<1x!tpu.dma_semaphore, #tpu.memory_space<semaphore_mem>>
    %257 = tpu.memref_squeeze %256 : memref<1x!tpu.dma_semaphore, #tpu.memory_space<semaphore_mem>> -> memref<!tpu.dma_semaphore, #tpu.memory_space<semaphore_mem>>
    tpu.wait_dma2 semaphore(%257 : memref<!tpu.dma_semaphore, #tpu.memory_space<semaphore_mem>>) src(%254 : memref<1x32xf32, #tpu.memory_space<any>>) dst(%255 : memref<1x32xf32, #tpu.memory_space<vmem>>)
    %c1_i32_231 = arith.constant 1 : i32
    %c0_i32_232 = arith.constant 0 : i32
    %258 = tpu.memref_slice %arg5[%70, %c0_i32_232] : memref<101x32xf32, #tpu.memory_space<any>> -> memref<1x32xf32, #tpu.memory_space<any>>
    %c7_i32_233 = arith.constant 7 : i32
    %c0_i32_234 = arith.constant 0 : i32
    %259 = tpu.memref_slice %arg8[%c7_i32_233, %c0_i32_234] : memref<128x32xf32, #tpu.memory_space<vmem>> -> memref<1x32xf32, #tpu.memory_space<vmem>>
    %260 = tpu.memref_slice %arg9[%c1_i32_231] : memref<3x!tpu.dma_semaphore, #tpu.memory_space<semaphore_mem>> -> memref<1x!tpu.dma_semaphore, #tpu.memory_space<semaphore_mem>>
    %261 = tpu.memref_squeeze %260 : memref<1x!tpu.dma_semaphore, #tpu.memory_space<semaphore_mem>> -> memref<!tpu.dma_semaphore, #tpu.memory_space<semaphore_mem>>
    tpu.wait_dma2 semaphore(%261 : memref<!tpu.dma_semaphore, #tpu.memory_space<semaphore_mem>>) src(%258 : memref<1x32xf32, #tpu.memory_space<any>>) dst(%259 : memref<1x32xf32, #tpu.memory_space<vmem>>)
    %c2_i32_235 = arith.constant 2 : i32
    %c0_i32_236 = arith.constant 0 : i32
    %262 = tpu.memref_slice %arg5[%73, %c0_i32_236] : memref<101x32xf32, #tpu.memory_space<any>> -> memref<1x32xf32, #tpu.memory_space<any>>
    %c15_i32_237 = arith.constant 15 : i32
    %c0_i32_238 = arith.constant 0 : i32
    %263 = tpu.memref_slice %arg8[%c15_i32_237, %c0_i32_238] : memref<128x32xf32, #tpu.memory_space<vmem>> -> memref<1x32xf32, #tpu.memory_space<vmem>>
    %264 = tpu.memref_slice %arg9[%c2_i32_235] : memref<3x!tpu.dma_semaphore, #tpu.memory_space<semaphore_mem>> -> memref<1x!tpu.dma_semaphore, #tpu.memory_space<semaphore_mem>>
    %265 = tpu.memref_squeeze %264 : memref<1x!tpu.dma_semaphore, #tpu.memory_space<semaphore_mem>> -> memref<!tpu.dma_semaphore, #tpu.memory_space<semaphore_mem>>
    tpu.wait_dma2 semaphore(%265 : memref<!tpu.dma_semaphore, #tpu.memory_space<semaphore_mem>>) src(%262 : memref<1x32xf32, #tpu.memory_space<any>>) dst(%263 : memref<1x32xf32, #tpu.memory_space<vmem>>)
    %c0_239 = arith.constant 0 : index
    %c0_240 = arith.constant 0 : index
    %266 = vector.load %arg7[%c0_239, %c0_240] : memref<8x32xf32, #tpu.memory_space<vmem>>, vector<8x32xf32>
    %c0_241 = arith.constant 0 : index
    %c0_242 = arith.constant 0 : index
    %267 = vector.load %arg8[%c0_241, %c0_242] : memref<128x32xf32, #tpu.memory_space<vmem>>, vector<128x32xf32>
    %cst_243 = arith.constant dense<0.000000e+00> : vector<8x128xf32>
    %268 = tpu.matmul %266, %267, %cst_243 {dimension_numbers = #tpu.dot_dimension_numbers<[1], [1], [0], [0], [0, 0, 1, 0], [], []>} : vector<8x32xf32>, vector<128x32xf32>, vector<8x128xf32> -> vector<8x128xf32>
    %c0_244 = arith.constant 0 : index
    %c0_245 = arith.constant 0 : index
    %269 = vector.load %arg6[%c0_244, %c0_245] : memref<8x128xf32, #tpu.memory_space<vmem>>, vector<8x128xf32>
    tpu.vector_store %arg6[%c0_244, %c0_245], %268 {strides = array<i32>} : memref<8x128xf32, #tpu.memory_space<vmem>>, vector<8x128xf32>,
    return
  }
  func.func @transform_2(%arg0: i32, %arg1: memref<8xi32, #tpu.memory_space<smem>>, %arg2: memref<8xi32, #tpu.memory_space<smem>>, %arg3: memref<8xi32, #tpu.memory_space<smem>>) -> (i32, i32) {
    %c0_i32 = arith.constant 0 : i32
    %c0_i32_0 = arith.constant 0 : i32
    %c0_i32_1 = arith.constant 0 : i32
    return %c0_i32, %c0_i32_0 : i32, i32
  }
}

</mosaic_0001>

<bundles_post_ra>
// kernel: tpu_custom_call.1
= control target key start
LH: loop header
LB: loop body
LE: loop exit
PB: predicated region body
PF: predicated region fallthrough
CT: control target
= control target key end

     0   :  { %s2483_s0 = inlined_call_operand.vmem [shape: s32[8], index: 0, kind: input, shape index: {}]   ;;  %s2484_s3 = inlined_call_operand.vmem [shape: f32[51,32], index: 3, kind: input, shape index: {}]   ;;  %s2485_s4 = inlined_call_operand.vmem [shape: f32[101,32], index: 4, kind: input, shape index: {}]   ;;  %s2486_s5 = inlined_call_operand.hbm [shape: f32[8,128], index: 5, kind: output, shape index: {}]   ;;  %s2487_s1 = inlined_call_operand.vmem [shape: s32[8], index: 1, kind: input, shape index: {}]   ;;  %s2488_s2 = inlined_call_operand.vmem [shape: s32[8], index: 2, kind: input, shape index: {}]  }
   0x1   :  { %2490 = sst [smem:[#allocation65_spill]] %s2486_s5  ;;  %s10_s20 = sshll.u32 %s2483_s0, 4  ;;  %s11_s20 = int_to_ptr.vmem [resolvable:$true] %s10_s20 }
   0x2   :  { %s14_s23 = sshll.u32 %s2487_s1, 4  ;;  %s2072_s24 = scalar_lea.vmem %s11_s20, 16  ;;  %s15_s23 = int_to_ptr.vmem [resolvable:$true] %s14_s23 }
   0x3   :  { %p2073_p0 = scmp.ne.s32.totalorder %s11_s20, %s2072_s24  ;;  %p2077_p1 = scmp.lt.s32.totalorder %s11_s20, %s11_s20 }
   0x4   :  { %p2078_p2 = scmp.lt.s32.totalorder %s2072_s24, %s2072_s24 }
   0x6   :  { %p2079_p3 = por %p2078_p2, %p2077_p1 }
   0x8   :  { %p2080_p4 = pnand %p2079_p3, %p2073_p0 }
   0xa   :  { %2083 = shalt.err (!%p2080_p4)  }
   0xb   :  { %s2182_s25 = smov [#allocation6]   ;;  %s2084_s26 = scalar_lea.vmem %s15_s23, 16 }
   0xc   :  { %13 = dma.vmem_to_smem %s11_s20, 16, %s2182_s25, [#allocation5] }
   0xd   :  { %p2085_p5 = scmp.ne.s32.totalorder %s15_s23, %s2084_s26  ;;  %p2089_p6 = scmp.lt.s32.totalorder %s15_s23, %s15_s23 }
   0xe   :  { %p2090_p7 = scmp.lt.s32.totalorder %s2084_s26, %s2084_s26 }
  0x10   :  { %p2091_p8 = por %p2090_p7, %p2089_p6 }
  0x12   :  { %p2092_p9 = pnand %p2091_p8, %p2085_p5 }
  0x14   :  { %2095 = shalt.err (!%p2092_p9)  }
  0x15   :  { %s2183_s0 = smov [#allocation7]   ;;  %s18_s28 = sshll.u32 %s2488_s2, 4  ;;  %s19_s28 = int_to_ptr.vmem [resolvable:$true] %s18_s28 }
  0x16   :  { %17 = dma.vmem_to_smem %s15_s23, 16, %s2183_s0, [#allocation5] }
  0x17   :  { %s2096_s29 = scalar_lea.vmem %s19_s28, 16  ;;  %p2101_p11 = scmp.lt.s32.totalorder %s19_s28, %s19_s28 }
  0x18   :  { %p2097_p10 = scmp.ne.s32.totalorder %s19_s28, %s2096_s29  ;;  %p2102_p12 = scmp.lt.s32.totalorder %s2096_s29, %s2096_s29 }
  0x1a   :  { %p2103_p13 = por %p2102_p12, %p2101_p11 }
  0x1c   :  { %p2104_p0 = pnand %p2103_p13, %p2097_p10 }
  0x1e   :  { %2107 = shalt.err (!%p2104_p0)  }
  0x1f   :  { %s2184_s30 = smov [#allocation8]  }
  0x20   :  { %21 = dma.vmem_to_smem %s19_s28, 16, %s2184_s30, [#allocation5] }
  0x21   :  { %2130 = dma.done.wait [#allocation5], 48 }
  0x22   :  { %2131 = vsyncadd [#allocation5], 4294967248 }
  0x23   :  { %23 = sfence }
  0x24   :  { %24 = vsyncpa [#allocation10], 0  ;;  %vm25_vm0 = vcmask 261120   ;;  %s2228_s6 = sld [smem:[#allocation7]]  ;;  %v2185_v0 = vmov 0.0   ;;  %s1787_s7 = sld [smem:[#allocation6 + $0x1]] }
  0x25   :  { %26 = vst.msk [vmem:[#allocation3 + $0x10] sm:$0xff] %vm25_vm0, %v2185_v0  ;;  %27 = vst.msk [vmem:[#allocation3 + $0x18] sm:$0xff] %vm25_vm0, %v2185_v0  ;;  %s50_s2 = sld [smem:[#allocation8]]  ;;  %s1793_s8 = sld [smem:[#allocation7 + $0x1]] }
  0x26   :  { %28 = vst.msk [vmem:[#allocation3 + $0x20] sm:$0xff] %vm25_vm0, %v2185_v0  ;;  %29 = vst.msk [vmem:[#allocation3 + $0x28] sm:$0xff] %vm25_vm0, %v2185_v0  ;;  %s2258_s9 = sld [smem:[#allocation8 + $0x1]]  ;;  %s2260_s10 = sld [smem:[#allocation6 + $0x2]] }
  0x27   :  { %30 = vst.msk [vmem:[#allocation3 + $0x30] sm:$0xff] %vm25_vm0, %v2185_v0  ;;  %31 = vst.msk [vmem:[#allocation3 + $0x38] sm:$0xff] %vm25_vm0, %v2185_v0  ;;  %s2262_s11 = sld [smem:[#allocation7 + $0x2]]  ;;  %s2266_s13 = sld [smem:[#allocation6 + $0x3]] }
  0x28   :  { %32 = vst.msk [vmem:[#allocation3 + $0x40] sm:$0xff] %vm25_vm0, %v2185_v0  ;;  %33 = vst.msk [vmem:[#allocation3 + $0x48] sm:$0xff] %vm25_vm0, %v2185_v0  ;;  %s2264_s12 = sld [smem:[#allocation8 + $0x2]]  ;;  %s2268_s14 = sld [smem:[#allocation7 + $0x3]] }
  0x29   :  { %34 = vst.msk [vmem:[#allocation3 + $0x50] sm:$0xff] %vm25_vm0, %v2185_v0  ;;  %35 = vst.msk [vmem:[#allocation3 + $0x58] sm:$0xff] %vm25_vm0, %v2185_v0  ;;  %s2270_s15 = sld [smem:[#allocation8 + $0x3]]  ;;  %s1841_s16 = sld [smem:[#allocation6 + $0x4]] }
  0x2a   :  { %36 = vst.msk [vmem:[#allocation3 + $0x60] sm:$0xff] %vm25_vm0, %v2185_v0  ;;  %37 = vst.msk [vmem:[#allocation3 + $0x68] sm:$0xff] %vm25_vm0, %v2185_v0  ;;  %p46_p1 = scmp.gt.s32.totalorder %s2228_s6, 0  ;;  %p1777_p2 = scmp.lt.s32.totalorder %s2228_s6, 100 }
  0x2b   :  { %38 = vst.msk [vmem:[#allocation3 + $0x70] sm:$0xff] %vm25_vm0, %v2185_v0  ;;  %39 = vst.msk [vmem:[#allocation3 + $0x78] sm:$0xff] %vm25_vm0, %v2185_v0  ;;  %p51_p3 = scmp.gt.s32.totalorder %s50_s2, 0  ;;  %p1782_p4 = scmp.lt.s32.totalorder %s50_s2, 100 }
  0x2c   :  { %s2503_s6 = smov (!%p46_p1, %s2228_s6), 0  ;;  %p56_p5 = scmp.gt.s32.totalorder %s1787_s7, 0 }
  0x2d   :  { %s2505_s2 = smov (!%p51_p3, %s50_s2), 0  ;;  %s2507_s6 = smov (!%p1777_p2, %s2503_s6), 100 }
  0x2e   :  { %s2509_s2 = smov (!%p1782_p4, %s2505_s2), 100  ;;  %p1788_p6 = scmp.lt.s32.totalorder %s1787_s7, 50 }
  0x2f   :  { %p61_p7 = scmp.gt.s32.totalorder %s1793_s8, 0  ;;  %p1794_p8 = scmp.lt.s32.totalorder %s1793_s8, 100 }
  0x30   :  { %s2511_s7 = smov (!%p56_p5, %s1787_s7), 0  ;;  %p66_p9 = scmp.gt.s32.totalorder %s2258_s9, 0 }
  0x31   :  { %s2513_s8 = smov (!%p61_p7, %s1793_s8), 0  ;;  %s2515_s7 = smov (!%p1788_p6, %s2511_s7), 50 }
  0x32   :  { %s2517_s8 = smov (!%p1794_p8, %s2513_s8), 100  ;;  %p1800_p10 = scmp.lt.s32.totalorder %s2258_s9, 100 }
  0x33   :  { %p71_p11 = scmp.gt.s32.totalorder %s2260_s10, 0  ;;  %p1806_p12 = scmp.lt.s32.totalorder %s2260_s10, 50 }
  0x34   :  { %s2519_s9 = smov (!%p66_p9, %s2258_s9), 0  ;;  %p76_p13 = scmp.gt.s32.totalorder %s2262_s11, 0 }
  0x35   :  { %s2521_s10 = smov (!%p71_p11, %s2260_s10), 0  ;;  %s2523_s9 = smov (!%p1800_p10, %s2519_s9), 100 }
  0x36   :  { %s2525_s10 = smov (!%p1806_p12, %s2521_s10), 50  ;;  %p1812_p0 = scmp.lt.s32.totalorder %s2262_s11, 100 }
  0x37   :  { %p81_p1 = scmp.gt.s32.totalorder %s2264_s12, 0  ;;  %p1818_p2 = scmp.lt.s32.totalorder %s2264_s12, 100 }
  0x38   :  { %s2527_s11 = smov (!%p76_p13, %s2262_s11), 0  ;;  %p86_p3 = scmp.gt.s32.totalorder %s2266_s13, 0 }
  0x39   :  { %s2529_s12 = smov (!%p81_p1, %s2264_s12), 0  ;;  %s2531_s11 = smov (!%p1812_p0, %s2527_s11), 100 }
  0x3a   :  { %s2533_s12 = smov (!%p1818_p2, %s2529_s12), 100  ;;  %p1824_p4 = scmp.lt.s32.totalorder %s2266_s13, 50 }
  0x3b   :  { %p91_p5 = scmp.gt.s32.totalorder %s2268_s14, 0  ;;  %p1830_p6 = scmp.lt.s32.totalorder %s2268_s14, 100 }
  0x3c   :  { %s2535_s13 = smov (!%p86_p3, %s2266_s13), 0  ;;  %p96_p7 = scmp.gt.s32.totalorder %s2270_s15, 0 }
  0x3d   :  { %s2537_s14 = smov (!%p91_p5, %s2268_s14), 0  ;;  %s2539_s13 = smov (!%p1824_p4, %s2535_s13), 50 }
  0x3e   :  { %s2541_s14 = smov (!%p1830_p6, %s2537_s14), 100  ;;  %p1836_p8 = scmp.lt.s32.totalorder %s2270_s15, 100 }
  0x3f   :  { %s1847_s17 = sld [smem:[#allocation7 + $0x4]]  ;;  %s2543_s15 = smov (!%p96_p7, %s2270_s15), 0 }
  0x40   :  { %s1853_s18 = sld [smem:[#allocation8 + $0x4]]  ;;  %s1859_s19 = sld [smem:[#allocation6 + $0x5]] }
  0x41   :  { %s2545_s15 = smov (!%p1836_p8, %s2543_s15), 100  ;;  %s1865_s20 = sld [smem:[#allocation7 + $0x5]] }
  0x42   :  { %s1871_s21 = sld [smem:[#allocation8 + $0x5]]  ;;  %s2318_s22 = sld [smem:[#allocation6 + $0x6]] }
  0x43   :  { %s2320_s23 = sld [smem:[#allocation7 + $0x6]]  ;;  %p101_p9 = scmp.gt.s32.totalorder %s1841_s16, 0 }
  0x44   :  { %p1842_p10 = scmp.lt.s32.totalorder %s1841_s16, 50  ;;  %s1889_s24 = sld [smem:[#allocation8 + $0x6]] }
  0x45   :  { %p106_p11 = scmp.gt.s32.totalorder %s1847_s17, 0  ;;  %p1848_p12 = scmp.lt.s32.totalorder %s1847_s17, 100 }
  0x46   :  { %s2547_s16 = smov (!%p101_p9, %s1841_s16), 0  ;;  %p111_p13 = scmp.gt.s32.totalorder %s1853_s18, 0 }
  0x47   :  { %s2549_s17 = smov (!%p106_p11, %s1847_s17), 0  ;;  %s2551_s16 = smov (!%p1842_p10, %s2547_s16), 50 }
  0x48   :  { %s2553_s17 = smov (!%p1848_p12, %s2549_s17), 100  ;;  %p1854_p0 = scmp.lt.s32.totalorder %s1853_s18, 100 }
  0x49   :  { %p116_p1 = scmp.gt.s32.totalorder %s1859_s19, 0  ;;  %p1860_p2 = scmp.lt.s32.totalorder %s1859_s19, 50 }
  0x4a   :  { %s2555_s18 = smov (!%p111_p13, %s1853_s18), 0  ;;  %p121_p3 = scmp.gt.s32.totalorder %s1865_s20, 0 }
  0x4b   :  { %s2557_s19 = smov (!%p116_p1, %s1859_s19), 0  ;;  %s2559_s18 = smov (!%p1854_p0, %s2555_s18), 100 }
  0x4c   :  { %s2561_s19 = smov (!%p1860_p2, %s2557_s19), 50  ;;  %p1866_p4 = scmp.lt.s32.totalorder %s1865_s20, 100 }
  0x4d   :  { %p126_p5 = scmp.gt.s32.totalorder %s1871_s21, 0  ;;  %p1872_p6 = scmp.lt.s32.totalorder %s1871_s21, 100 }
  0x4e   :  { %s2563_s20 = smov (!%p121_p3, %s1865_s20), 0  ;;  %p131_p7 = scmp.gt.s32.totalorder %s2318_s22, 0 }
  0x4f   :  { %s2565_s21 = smov (!%p126_p5, %s1871_s21), 0  ;;  %s2567_s20 = smov (!%p1866_p4, %s2563_s20), 100 }
  0x50   :  { %s2569_s21 = smov (!%p1872_p6, %s2565_s21), 100  ;;  %p1878_p8 = scmp.lt.s32.totalorder %s2318_s22, 50 }
  0x51   :  { %p136_p9 = scmp.gt.s32.totalorder %s2320_s23, 0  ;;  %p1884_p10 = scmp.lt.s32.totalorder %s2320_s23, 100 }
  0x52   :  { %s2571_s22 = smov (!%p131_p7, %s2318_s22), 0  ;;  %s1895_s25 = sld [smem:[#allocation6 + $0x7]] }
  0x53   :  { %s2573_s23 = smov (!%p136_p9, %s2320_s23), 0  ;;  %s2575_s22 = smov (!%p1878_p8, %s2571_s22), 50 }
  0x54   :  { %s2577_s23 = smov (!%p1884_p10, %s2573_s23), 100  ;;  %s1901_s26 = sld [smem:[#allocation7 + $0x7]] }
  0x55   :  { %s1907_s0 = sld [smem:[#allocation8 + $0x7]]  ;;  %s40_s1 = sld [smem:[#allocation6]] }
  0x56   :  { %p141_p11 = scmp.gt.s32.totalorder %s1889_s24, 0  ;;  %p1890_p12 = scmp.lt.s32.totalorder %s1889_s24, 100 }
  0x58   :  { %p146_p13 = scmp.gt.s32.totalorder %s1895_s25, 0  ;;  %p1896_p0 = scmp.lt.s32.totalorder %s1895_s25, 50 }
  0x59   :  { %s2579_s24 = smov (!%p141_p11, %s1889_s24), 0 }
  0x5a   :  { %s2581_s25 = smov (!%p146_p13, %s1895_s25), 0  ;;  %s2583_s24 = smov (!%p1890_p12, %s2579_s24), 100 }
  0x5b   :  { %2491 = sst [smem:[#allocation61_spill]] %s2583_s24  ;;  %s2585_s25 = smov (!%p1896_p0, %s2581_s25), 50 }
  0x5c   :  { %2492 = sst [smem:[#allocation62_spill]] %s2585_s25  ;;  %p151_p1 = scmp.gt.s32.totalorder %s1901_s26, 0 }
  0x5d   :  { %p1902_p2 = scmp.lt.s32.totalorder %s1901_s26, 100  ;;  %p156_p3 = scmp.gt.s32.totalorder %s1907_s0, 0 }
  0x5e   :  { %p1908_p4 = scmp.lt.s32.totalorder %s1907_s0, 100  ;;  %s2587_s26 = smov (!%p151_p1, %s1901_s26), 0 }
  0x5f   :  { %s2589_s0 = smov (!%p156_p3, %s1907_s0), 0  ;;  %s2591_s26 = smov (!%p1902_p2, %s2587_s26), 100 }
  0x60   :  { %2493 = sst [smem:[#allocation63_spill]] %s2591_s26  ;;  %s2593_s0 = smov (!%p1908_p4, %s2589_s0), 100 }
  0x61   :  { %2494 = sst [smem:[#allocation64_spill]] %s2593_s0  ;;  %p41_p5 = scmp.gt.s32.totalorder %s40_s1, 0 }
  0x62   :  { %p1772_p6 = scmp.lt.s32.totalorder %s40_s1, 50 }
  0x63   :  { %s2595_s1 = smov (!%p41_p5, %s40_s1), 0 }
  0x64   :  { %s2597_s1 = smov (!%p1772_p6, %s2595_s1), 50 }
  0x65   :  { %s160_s29 = scalar_lea.vmem %s2484_s3, %s2597_s1 }
  0x66   :  { %v178_v1 = vld [vmem:[%s160_s29] sm:$0x1] }
  0x67   :  { %179 = vst [vmem:[#allocation2] sm:$0x1] %v178_v1 }
  0x68   :  { %204 = vsyncadd [#allocation4], 16  ;;  %s205_s25 = scalar_lea.vmem %s2485_s4, %s2507_s6 }
  0x69   :  { %v224_v2 = vld [vmem:[%s205_s25] sm:$0x1] }
  0x6a   :  { %225 = vst [vmem:[#allocation3] sm:$0x1] %v224_v2 }
  0x6b   :  { %250 = vsyncadd [#allocation4 + $0x1], 16  ;;  %s251_s24 = scalar_lea.vmem %s2485_s4, %s2509_s2 }
  0x6c   :  { %v271_v3 = vld [vmem:[%s251_s24] sm:$0x1] }
  0x6d   :  { %272 = vst [vmem:[#allocation3 + $0x8] sm:$0x1] %v271_v3 }
  0x6e   :  { %297 = vsyncadd [#allocation4 + $0x2], 16  ;;  %s298_s28 = scalar_lea.vmem %s2484_s3, %s2515_s7 }
  0x6f   :  { %v317_v4 = vld [vmem:[%s298_s28] sm:$0x1] }
  0x70   :  { %318 = vst [vmem:[#allocation2 + $0x1] sm:$0x1] %v317_v4 }
  0x71   :  { %343 = vsyncadd [#allocation4], 16  ;;  %s344_s25 = scalar_lea.vmem %s2485_s4, %s2517_s8 }
  0x72   :  { %v363_v5 = vld [vmem:[%s344_s25] sm:$0x1] }
  0x73   :  { %364 = vst [vmem:[#allocation3 + $0x1] sm:$0x1] %v363_v5 }
  0x74   :  { %389 = vsyncadd [#allocation4 + $0x1], 16  ;;  %s390_s26 = scalar_lea.vmem %s2485_s4, %s2523_s9 }
  0x75   :  { %v409_v6 = vld [vmem:[%s390_s26] sm:$0x1] }
  0x76   :  { %410 = vst [vmem:[#allocation3 + $0x9] sm:$0x1] %v409_v6 }
  0x77   :  { %435 = vsyncadd [#allocation4 + $0x2], 16  ;;  %s436_s29 = scalar_lea.vmem %s2484_s3, %s2525_s10 }
  0x78   :  { %v455_v7 = vld [vmem:[%s436_s29] sm:$0x1] }
  0x79   :  { %456 = vst [vmem:[#allocation2 + $0x2] sm:$0x1] %v455_v7 }
  0x7a   :  { %481 = vsyncadd [#allocation4], 16  ;;  %s482_s1 = scalar_lea.vmem %s2485_s4, %s2531_s11 }
  0x7b   :  { %v501_v8 = vld [vmem:[%s482_s1] sm:$0x1] }
  0x7c   :  { %502 = vst [vmem:[#allocation3 + $0x2] sm:$0x1] %v501_v8 }
  0x7d   :  { %527 = vsyncadd [#allocation4 + $0x1], 16  ;;  %s528_s28 = scalar_lea.vmem %s2485_s4, %s2533_s12 }
  0x7e   :  { %v547_v9 = vld [vmem:[%s528_s28] sm:$0x1] }
  0x7f   :  { %548 = vst [vmem:[#allocation3 + $0xa] sm:$0x1] %v547_v9 }
  0x80   :  { %573 = vsyncadd [#allocation4 + $0x2], 16  ;;  %s574_s6 = scalar_lea.vmem %s2484_s3, %s2539_s13 }
  0x81   :  { %v593_v10 = vld [vmem:[%s574_s6] sm:$0x1] }
  0x82   :  { %594 = vst [vmem:[#allocation2 + $0x3] sm:$0x1] %v593_v10 }
  0x83   :  { %619 = vsyncadd [#allocation4], 16  ;;  %s620_s2 = scalar_lea.vmem %s2485_s4, %s2541_s14 }
  0x84   :  { %v639_v11 = vld [vmem:[%s620_s2] sm:$0x1] }
  0x85   :  { %640 = vst [vmem:[#allocation3 + $0x3] sm:$0x1] %v639_v11 }
  0x86   :  { %665 = vsyncadd [#allocation4 + $0x1], 16  ;;  %s666_s26 = scalar_lea.vmem %s2485_s4, %s2545_s15 }
  0x87   :  { %v685_v12 = vld [vmem:[%s666_s26] sm:$0x1] }
  0x88   :  { %686 = vst [vmem:[#allocation3 + $0xb] sm:$0x1] %v685_v12 }
  0x89   :  { %711 = vsyncadd [#allocation4 + $0x2], 16  ;;  %s712_s0 = scalar_lea.vmem %s2484_s3, %s2551_s16 }
  0x8a   :  { %v731_v13 = vld [vmem:[%s712_s0] sm:$0x1] }
  0x8b   :  { %732 = vst [vmem:[#allocation2 + $0x4] sm:$0x1] %v731_v13 }
  0x8c   :  { %757 = vsyncadd [#allocation4], 16  ;;  %s758_s8 = scalar_lea.vmem %s2485_s4, %s2553_s17 }
  0x8d   :  { %v777_v14 = vld [vmem:[%s758_s8] sm:$0x1] }
  0x8e   :  { %778 = vst [vmem:[#allocation3 + $0x4] sm:$0x1] %v777_v14 }
  0x8f   :  { %803 = vsyncadd [#allocation4 + $0x1], 16  ;;  %s804_s1 = scalar_lea.vmem %s2485_s4, %s2559_s18 }
  0x90   :  { %v823_v15 = vld [vmem:[%s804_s1] sm:$0x1] }
  0x91   :  { %824 = vst [vmem:[#allocation3 + $0xc] sm:$0x1] %v823_v15 }
  0x92   :  { %849 = vsyncadd [#allocation4 + $0x2], 16  ;;  %s850_s27 = scalar_lea.vmem %s2484_s3, %s2561_s19 }
  0x93   :  { %v869_v16 = vld [vmem:[%s850_s27] sm:$0x1] }
  0x94   :  { %870 = vst [vmem:[#allocation2 + $0x5] sm:$0x1] %v869_v16 }
  0x95   :  { %895 = vsyncadd [#allocation4], 16  ;;  %s896_s10 = scalar_lea.vmem %s2485_s4, %s2567_s20 }
  0x96   :  { %v915_v17 = vld [vmem:[%s896_s10] sm:$0x1] }
  0x97   :  { %916 = vst [vmem:[#allocation3 + $0x5] sm:$0x1] %v915_v17 }
  0x98   :  { %941 = vsyncadd [#allocation4 + $0x1], 16  ;;  %s942_s6 = scalar_lea.vmem %s2485_s4, %s2569_s21 }
  0x99   :  { %v961_v18 = vld [vmem:[%s942_s6] sm:$0x1] }
  0x9a   :  { %962 = vst [vmem:[#allocation3 + $0xd] sm:$0x1] %v961_v18 }
  0x9b   :  { %987 = vsyncadd [#allocation4 + $0x2], 16  ;;  %s988_s25 = scalar_lea.vmem %s2484_s3, %s2575_s22 }
  0x9c   :  { %v1007_v19 = vld [vmem:[%s988_s25] sm:$0x1] }
  0x9d   :  { %1008 = vst [vmem:[#allocation2 + $0x6] sm:$0x1] %v1007_v19 }
  0x9e   :  { %1033 = vsyncadd [#allocation4], 16  ;;  %s1034_s12 = scalar_lea.vmem %s2485_s4, %s2577_s23 }
  0x9f   :  { %v1053_v20 = vld [vmem:[%s1034_s12] sm:$0x1] }
  0xa0   :  { %1054 = vst [vmem:[#allocation3 + $0x6] sm:$0x1] %v1053_v20 }
  0xa1   :  { %1079 = vsyncadd [#allocation4 + $0x1], 16  ;;  %s2495_s21 = sld [smem:[#allocation61_spill]] }
  0xa7   :  { %s1080_s13 = scalar_lea.vmem %s2485_s4, %s2495_s21 }
  0xa8   :  { %v1099_v21 = vld [vmem:[%s1080_s13] sm:$0x1] }
  0xa9   :  { %1100 = vst [vmem:[#allocation3 + $0xe] sm:$0x1] %v1099_v21 }
  0xaa   :  { %1125 = vsyncadd [#allocation4 + $0x2], 16  ;;  %s2496_s22 = sld [smem:[#allocation62_spill]] }
  0xb0   :  { %s1126_s14 = scalar_lea.vmem %s2484_s3, %s2496_s22 }
  0xb1   :  { %v1145_v22 = vld [vmem:[%s1126_s14] sm:$0x1] }
  0xb2   :  { %1146 = vst [vmem:[#allocation2 + $0x7] sm:$0x1] %v1145_v22 }
  0xb3   :  { %1171 = vsyncadd [#allocation4], 16  ;;  %s2497_s23 = sld [smem:[#allocation63_spill]] }
  0xb9   :  { %s1172_s15 = scalar_lea.vmem %s2485_s4, %s2497_s23 }
  0xba   :  { %v1191_v23 = vld [vmem:[%s1172_s15] sm:$0x1] }
  0xbb   :  { %1192 = vst [vmem:[#allocation3 + $0x7] sm:$0x1] %v1191_v23 }
  0xbc   :  { %1217 = vsyncadd [#allocation4 + $0x1], 16  ;;  %s2498_s30 = sld [smem:[#allocation64_spill]] }
  0xc2   :  { %s1218_s9 = scalar_lea.vmem %s2485_s4, %s2498_s30 }
  0xc3   :  { %v1237_v24 = vld [vmem:[%s1218_s9] sm:$0x1] }
  0xc4   :  { %1238 = vst [vmem:[#allocation3 + $0xf] sm:$0x1] %v1237_v24 }
  0xc5   :  { %1263 = vsyncadd [#allocation4 + $0x2], 16 }
  0xc6   :  { %2132 = dma.done.wait [#allocation4], 16 }
  0xc7   :  { %2133 = vsyncadd [#allocation4], 4294967280 }
  0xc8   :  { %2134 = dma.done.wait [#allocation4 + $0x1], 16 }
  0xc9   :  { %2135 = vsyncadd [#allocation4 + $0x1], 4294967280 }
  0xca   :  { %2136 = dma.done.wait [#allocation4 + $0x2], 16 }
  0xcb   :  { %2137 = vsyncadd [#allocation4 + $0x2], 4294967280 }
  0xcc   :  { %2138 = dma.done.wait [#allocation4], 16 }
  0xcd   :  { %2139 = vsyncadd [#allocation4], 4294967280 }
  0xce   :  { %2140 = dma.done.wait [#allocation4 + $0x1], 16 }
  0xcf   :  { %2141 = vsyncadd [#allocation4 + $0x1], 4294967280 }
  0xd0   :  { %2142 = dma.done.wait [#allocation4 + $0x2], 16 }
  0xd1   :  { %2143 = vsyncadd [#allocation4 + $0x2], 4294967280 }
  0xd2   :  { %2144 = dma.done.wait [#allocation4], 16 }
  0xd3   :  { %2145 = vsyncadd [#allocation4], 4294967280 }
  0xd4   :  { %2146 = dma.done.wait [#allocation4 + $0x1], 16 }
  0xd5   :  { %2147 = vsyncadd [#allocation4 + $0x1], 4294967280 }
  0xd6   :  { %2148 = dma.done.wait [#allocation4 + $0x2], 16 }
  0xd7   :  { %2149 = vsyncadd [#allocation4 + $0x2], 4294967280 }
  0xd8   :  { %2150 = dma.done.wait [#allocation4], 16 }
  0xd9   :  { %2151 = vsyncadd [#allocation4], 4294967280 }
  0xda   :  { %2152 = dma.done.wait [#allocation4 + $0x1], 16 }
  0xdb   :  { %2153 = vsyncadd [#allocation4 + $0x1], 4294967280 }
  0xdc   :  { %2154 = dma.done.wait [#allocation4 + $0x2], 16 }
  0xdd   :  { %2155 = vsyncadd [#allocation4 + $0x2], 4294967280 }
  0xde   :  { %2156 = dma.done.wait [#allocation4], 16 }
  0xdf   :  { %2157 = vsyncadd [#allocation4], 4294967280 }
  0xe0   :  { %2158 = dma.done.wait [#allocation4 + $0x1], 16 }
  0xe1   :  { %2159 = vsyncadd [#allocation4 + $0x1], 4294967280 }
  0xe2   :  { %2160 = dma.done.wait [#allocation4 + $0x2], 16 }
  0xe3   :  { %2161 = vsyncadd [#allocation4 + $0x2], 4294967280 }
  0xe4   :  { %2162 = dma.done.wait [#allocation4], 16 }
  0xe5   :  { %2163 = vsyncadd [#allocation4], 4294967280 }
  0xe6   :  { %2164 = dma.done.wait [#allocation4 + $0x1], 16 }
  0xe7   :  { %2165 = vsyncadd [#allocation4 + $0x1], 4294967280 }
  0xe8   :  { %2166 = dma.done.wait [#allocation4 + $0x2], 16 }
  0xe9   :  { %2167 = vsyncadd [#allocation4 + $0x2], 4294967280 }
  0xea   :  { %2168 = dma.done.wait [#allocation4], 16 }
  0xeb   :  { %2169 = vsyncadd [#allocation4], 4294967280 }
  0xec   :  { %2170 = dma.done.wait [#allocation4 + $0x1], 16 }
  0xed   :  { %2171 = vsyncadd [#allocation4 + $0x1], 4294967280 }
  0xee   :  { %2172 = dma.done.wait [#allocation4 + $0x2], 16 }
  0xef   :  { %2173 = vsyncadd [#allocation4 + $0x2], 4294967280 }
  0xf0   :  { %2174 = dma.done.wait [#allocation4], 16 }
  0xf1   :  { %2175 = vsyncadd [#allocation4], 4294967280 }
  0xf2   :  { %2176 = dma.done.wait [#allocation4 + $0x1], 16 }
  0xf3   :  { %2177 = vsyncadd [#allocation4 + $0x1], 4294967280 }
  0xf4   :  { %2178 = dma.done.wait [#allocation4 + $0x2], 16 }
  0xf5   :  { %2179 = vsyncadd [#allocation4 + $0x2], 4294967280  ;;  %v2186_v25 = vmov 0.0|0.0   ;;  %vm2187_vm1 = vmmov 0   ;;  %v1314_v26 = vld [vmem:[#allocation3] sm:$0xff]  ;;  %v1315_v27 = vld [vmem:[#allocation3 + $0x8] sm:$0xff] }
  0xf6   :  { %2033 = vmatprep.subr.bf16.mxu0 %v2186_v25  ;;  %2030 = vmatprep.mubr.msk.f32.mxu0 %vm2187_vm1, %v2185_v0  ;;  %vm2450_vm2 = vmpackc.low %vm25_vm0, %vm25_vm0  ;;  %v2034_v29 = vpack.c.bf16 %v1315_v27, %v1314_v26  ;;  %v1316_v30 = vld [vmem:[#allocation3 + $0x10] sm:$0xff]  ;;  %v1317_v31 = vld [vmem:[#allocation3 + $0x18] sm:$0xff]  ;;  %s2188_s3 = smov [#allocation9]  }
  0xf7   :  { %v2038_v32 = vpack.c.bf16 %v1317_v31, %v1316_v30  ;;  %v1318_v33 = vld [vmem:[#allocation3 + $0x20] sm:$0xff]  ;;  %v1319_v34 = vld [vmem:[#allocation3 + $0x28] sm:$0xff]  ;;  %v1320_v36 = vld [vmem:[#allocation3 + $0x30] sm:$0xff]  ;;  %s1458_s4 = sshll.u32 %s2188_s3, 4  ;;  %s1459_s4 = int_to_ptr.vmem [resolvable:$true] %s1458_s4 }
  0xf8   :  { %2036 = vmatpush3.bf16.xpose.msk.msra.mxu0 %vm2450_vm2, %v2034_v29  ;;  %v2042_v35 = vpack.c.bf16 %v1319_v34, %v1318_v33  ;;  %v1321_v37 = vld [vmem:[#allocation3 + $0x38] sm:$0xff]  ;;  %v1322_v39 = vld [vmem:[#allocation3 + $0x40] sm:$0xff]  ;;  %v1323_v40 = vld [vmem:[#allocation3 + $0x48] sm:$0xff]  ;;  %s2108_s27 = scalar_lea.vmem %s1459_s4, 128  ;;  %p2113_p8 = scmp.lt.s32.totalorder %s1459_s4, %s1459_s4 }
  0xf9   :  { %2037 = vmatprep.subr.bf16.mxu0 %v2186_v25  ;;  %v2046_v38 = vpack.c.bf16 %v1321_v37, %v1320_v36  ;;  %v2050_v41 = vpack.c.bf16 %v1323_v40, %v1322_v39  ;;  %v1324_v42 = vld [vmem:[#allocation3 + $0x50] sm:$0xff]  ;;  %v1325_v43 = vld [vmem:[#allocation3 + $0x58] sm:$0xff]  ;;  %v1326_v45 = vld [vmem:[#allocation3 + $0x60] sm:$0xff]  ;;  %p2109_p7 = scmp.ne.s32.totalorder %s1459_s4, %s2108_s27  ;;  %p2114_p9 = scmp.lt.s32.totalorder %s2108_s27, %s2108_s27 }
  0xfa   :  { %v2054_v44 = vpack.c.bf16 %v1325_v43, %v1324_v42  ;;  %v1327_v46 = vld [vmem:[#allocation3 + $0x68] sm:$0xff]  ;;  %v1328_v48 = vld [vmem:[#allocation3 + $0x70] sm:$0xff]  ;;  %v1329_v49 = vld [vmem:[#allocation3 + $0x78] sm:$0xff] }
  0xfb   :  { %v2058_v47 = vpack.c.bf16 %v1327_v46, %v1326_v45  ;;  %v2062_v50 = vpack.c.bf16 %v1329_v49, %v1328_v48  ;;  %v1313_v51 = vld [vmem:[#allocation2] sm:$0xff]  ;;  %p2115_p10 = por %p2114_p9, %p2113_p8 }
  0xfd   :  { %p2116_p11 = pnand %p2115_p10, %p2109_p7 }
 0x100   :  { %2040 = vmatpush3.bf16.xpose.msk.msra.mxu0 %vm2450_vm2, %v2038_v32 }
 0x101   :  { %2041 = vmatprep.subr.bf16.mxu0 %v2186_v25 }
 0x108   :  { %2044 = vmatpush3.bf16.xpose.msk.msra.mxu0 %vm2450_vm2, %v2042_v35 }
 0x109   :  { %2045 = vmatprep.subr.bf16.mxu0 %v2186_v25 }
 0x110   :  { %2048 = vmatpush3.bf16.xpose.msk.msra.mxu0 %vm2450_vm2, %v2046_v38 }
 0x111   :  { %2049 = vmatprep.subr.bf16.mxu0 %v2186_v25 }
 0x118   :  { %2052 = vmatpush3.bf16.xpose.msk.msra.mxu0 %vm2450_vm2, %v2050_v41 }
 0x119   :  { %2053 = vmatprep.subr.bf16.mxu0 %v2186_v25 }
 0x120   :  { %2056 = vmatpush3.bf16.xpose.msk.msra.mxu0 %vm2450_vm2, %v2054_v44 }
 0x121   :  { %2057 = vmatprep.subr.bf16.mxu0 %v2186_v25 }
 0x128   :  { %2060 = vmatpush3.bf16.xpose.msk.msra.mxu0 %vm2450_vm2, %v2058_v47 }
 0x129   :  { %2061 = vmatprep.subr.bf16.mxu0 %v2186_v25 }
 0x130   :  { %2064 = vmatpush3.bf16.xpose.msk.msra.mxu0 %vm2450_vm2, %v2062_v50 }
 0x137   :  { %2031 = vmatmul.mubr.msk.f32.vlgmr.msra.gmra.mrb[0].mxu0 %vm25_vm0, %v1313_v51 }
 0x20a   :  { %v1447_v52 = vpop.f32.mrb[0].mxu0 }
 0x20b   :  { %1451 = vst [vmem:[#allocation9] sm:$0xff] %v1447_v52  ;;  %v2032_v53 = vpop.f32.mrb[1].mxu0 }
 0x20c   :  { %2119 = shalt.err (!%p2116_p11)
}
 0x20d   :  { %s2501_s10 = sld [smem:[#allocation65_spill]] }
 0x213   :  { %s2120_s18 = scalar_lea.hbm %s2501_s10, 128 }
 0x214   :  { %p2121_p12 = scmp.ne.s32.totalorder %s2501_s10, %s2120_s18  ;;  %p2124_p13 = scmp.lt.u32.totalorder %s2120_s18, %s2501_s10 }
 0x216   :  { %p2126_p0 = pnand %p2124_p13, %p2121_p12 }
 0x218   :  { %2129 = shalt.err (!%p2126_p0)
}
 0x219   :  { %1461 = dma.vmem_to_hbm [thread:$0]  %s1459_s4, 128, %s2501_s10, [#allocation10]  }
 0x21a   :  { %2180 = dma.done.wait [#allocation10], 128  }
 0x21b   :  { %2181 = vsyncadd [#allocation10], 4294967168 }
 0x21c   :  { %1465 = vsyncpa [#allocation10], 1 }
 0x21d   :  { %1466 = vsyncmov [#allocation4] }
 0x220   :  { %s1467_s2 = vpop.sfrf %1466 }
 0x221   :  { %p1930_p1 = scmp.ne.s32.totalorder %s1467_s2, 0 }
 0x223   :  { %1471 = shalt.err (%p1930_p1)  }
 0x224   :  { %1473 = vsyncmov [#allocation4 + $0x1] }
 0x227   :  { %s1474_s12 = vpop.sfrf %1473 }
 0x228   :  { %p1931_p2 = scmp.ne.s32.totalorder %s1474_s12, 0 }
 0x22a   :  { %1478 = shalt.err (%p1931_p2)  }
 0x22b   :  { %1480 = vsyncmov [#allocation4 + $0x2] }
 0x22e   :  { %s1481_s21 = vpop.sfrf %1480 }
 0x22f   :  { %p1932_p3 = scmp.ne.s32.totalorder %s1481_s21, 0 }
 0x231   :  { %1485 = shalt.err (%p1932_p3)  }

</bundles_post_ra>
